<compile_context>
chip_gen: v6e
topology: v6e:2x2x1
jax: 0.10.0
libtpu: 0.0.40
codegen_flags: <defaults>
</compile_context>

<pallas_src>
import jax
import jax.numpy as jnp
from jax.experimental import pallas as pl
from jax.experimental.pallas import tpu as pltpu


def ngram_kernel(ids_ref,   # VMEM (Bt, ctx)            int32
                 emb_ref,   # VMEM (vocab, emb_dim)     f32
                 w1_ref,    # VMEM (ctx, emb_dim, 128)  f32
                 b1_ref,    # VMEM (1, 128)             f32
                 w2_ref,    # VMEM (128, vocab)         f32
                 b2_ref,    # VMEM (1, vocab)           f32
                 out_ref):  # VMEM (Bt, vocab)          f32
    bt, ctx = ids_ref.shape
    vocab, _ = emb_ref.shape
    hidden = w1_ref.shape[2]

    ids = ids_ref[...]                                            # (Bt, ctx) i32
    emb = emb_ref[...]                                            # (vocab, emb)
    vocab_iota = jax.lax.broadcasted_iota(jnp.int32, (bt, vocab), 1)

    # Embedding gather (one-hot MXU matmul per context slot) fused with
    # linear1:   concat_c(e_c) @ W1_flat  ==  sum_c e_c @ W1[c].
    acc = jnp.zeros((bt, hidden), jnp.float32)
    for c in range(ctx):                                          # static, tiny
        onehot = (vocab_iota == ids[:, c:c + 1]).astype(emb.dtype)      # (Bt, V)
        e_c = jnp.dot(onehot, emb, preferred_element_type=jnp.float32)  # (Bt, E)
        acc = acc + jnp.dot(e_c.astype(w1_ref.dtype), w1_ref[c],
                            preferred_element_type=jnp.float32)         # (Bt, 128)

    h = jnp.maximum(acc + b1_ref[...].astype(jnp.float32), 0.0)   # ReLU (Bt, 128)

    logits = jnp.dot(h.astype(w2_ref.dtype), w2_ref[...],
                     preferred_element_type=jnp.float32)
    logits = logits + b2_ref[...].astype(jnp.float32)             # (Bt, vocab)

    # log_softmax over the vocab axis (f32, numerically stable).
    m = jnp.max(logits, axis=-1, keepdims=True)                   # XLU reduce
    shifted = logits - m
    lse = jnp.log(jnp.sum(jnp.exp(shifted), axis=-1, keepdims=True))  # EUP + XLU
    out_ref[...] = (shifted - lse).astype(out_ref.dtype)


def ngram_forward(token_ids, emb, w1, b1, w2, b2, *, batch_tile=128):
    """Batched forward.  token_ids: (B, context_size) int32 (or 1-D for a
    single context).  Returns (B, vocab) float32 log-probs."""
    if token_ids.ndim == 1:
        token_ids = token_ids[None, :]          # like the torch .view((1, -1))
    B, ctx = token_ids.shape
    vocab, emb_dim = emb.shape
    hidden = w1.shape[2]

    # Batch tile: multiple of 8 sublanes; 128 fills MXU rows on v5e and is a
    # fine tile on v6e/v7x at these weight sizes (all blocks << VMEM).
    bt = min(batch_tile, pl.cdiv(B, 8) * 8)
    n_tiles = pl.cdiv(B, bt)
    Bp = n_tiles * bt
    token_ids = token_ids.astype(jnp.int32)
    if Bp != B:
        token_ids = jnp.pad(token_ids, ((0, Bp - B), (0, 0)))     # pad with id 0

    flops = 2 * Bp * (ctx * vocab * emb_dim          # one-hot gather matmuls
                      + ctx * emb_dim * hidden       # linear1
                      + hidden * vocab)              # linear2
    bytes_accessed = (token_ids.nbytes + emb.nbytes + w1.nbytes + b1.nbytes
                      + w2.nbytes + b2.nbytes + Bp * vocab * 4)
    cost = pl.CostEstimate(flops=int(flops),
                           transcendentals=int(Bp * vocab + Bp),
                           bytes_accessed=int(bytes_accessed))

    out = pl.pallas_call(
        ngram_kernel,
        out_shape=jax.ShapeDtypeStruct((Bp, vocab), jnp.float32),
        grid=(n_tiles,),
        in_specs=[
            pl.BlockSpec((bt, ctx), lambda b: (b, 0)),                  # token ids
            pl.BlockSpec((vocab, emb_dim), lambda b: (0, 0)),           # emb table
            pl.BlockSpec((ctx, emb_dim, hidden), lambda b: (0, 0, 0)),  # w1
            pl.BlockSpec((1, hidden), lambda b: (0, 0)),                # b1
            pl.BlockSpec((hidden, vocab), lambda b: (0, 0)),            # w2
            pl.BlockSpec((1, vocab), lambda b: (0, 0)),                 # b2
        ],
        out_specs=pl.BlockSpec((bt, vocab), lambda b: (b, 0)),
        compiler_params=pltpu.CompilerParams(
            dimension_semantics=("parallel",)),
        cost_estimate=cost,
    )(token_ids, emb, w1, b1, w2, b2)

    return out[:B]


def reference_forward(token_ids, emb, w1, b1, w2, b2):
    """Pure-JAX reference mirroring the PyTorch forward, batched row-wise."""
    if token_ids.ndim == 1:
        token_ids = token_ids[None, :]
    ctx, emb_dim, hidden = w1.shape
    x = jnp.take(emb, token_ids, axis=0).reshape(token_ids.shape[0], ctx * emb_dim)
    h = jnp.maximum(x @ w1.reshape(ctx * emb_dim, hidden) + b1, 0.0)
    logits = h @ w2 + b2
    return jax.nn.log_softmax(logits, axis=-1)


if __name__ == "__main__":
    vocab_size, embedding_dim, context_size, hidden = 256, 16, 2, 128
    batch = 256   # 2 batch tiles of 128 -> grid=(2,), exercises the parallel axis

    key = jax.random.PRNGKey(0)
    k_emb, k_w1, k_b1, k_w2, k_b2, k_in = jax.random.split(key, 6)

    # PyTorch-like init: N(0,1) embedding, uniform(+-1/sqrt(fan_in)) linears.
    emb = jax.random.normal(k_emb, (vocab_size, embedding_dim), jnp.float32)
    lim1 = 1.0 / (context_size * embedding_dim) ** 0.5
    w1 = jax.random.uniform(k_w1, (context_size, embedding_dim, hidden),
                            jnp.float32, -lim1, lim1)
    b1 = jax.random.uniform(k_b1, (1, hidden), jnp.float32, -lim1, lim1)
    lim2 = 1.0 / hidden ** 0.5
    w2 = jax.random.uniform(k_w2, (hidden, vocab_size), jnp.float32, -lim2, lim2)
    b2 = jax.random.uniform(k_b2, (1, vocab_size), jnp.float32, -lim2, lim2)

    # A batch of n-gram contexts (token ids).
    token_ids = jax.random.randint(k_in, (batch, context_size), 0, vocab_size,
                                   jnp.int32)

    log_probs = ngram_forward(token_ids, emb, w1, b1, w2, b2)
    jax.block_until_ready(log_probs)

    ref = reference_forward(token_ids, emb, w1, b1, w2, b2)
    assert log_probs.shape == (batch, vocab_size)
    assert jnp.allclose(log_probs, ref, atol=1e-4, rtol=1e-4), "mismatch vs reference"

    # Single-context path, matching the PyTorch module's (1, vocab) output.
    single = ngram_forward(token_ids[0], emb, w1, b1, w2, b2)
    jax.block_until_ready(single)
    assert single.shape == (1, vocab_size)
    assert jnp.allclose(single, ref[0:1], atol=1e-4, rtol=1e-4), "single-context mismatch"

    print("KERNEL_OK")
</pallas_src>

<mosaic_0001>
module attributes {stable_mosaic.version = 11 : i64} {
  func.func @ngram_kernel(%arg0: i32, %arg1: memref<128x2xi32, #tpu.memory_space<vmem>>, %arg2: memref<256x16xf32, #tpu.memory_space<vmem>>, %arg3: memref<2x16x128xf32, #tpu.memory_space<vmem>>, %arg4: memref<1x128xf32, #tpu.memory_space<vmem>>, %arg5: memref<128x256xf32, #tpu.memory_space<vmem>>, %arg6: memref<1x256xf32, #tpu.memory_space<vmem>>, %arg7: memref<128x256xf32, #tpu.memory_space<vmem>>) attributes {dimension_semantics = [#tpu.dimension_semantics<parallel>], iteration_bounds = array<i64: 2>, scalar_prefetch = 0 : i64, scratch_operands = 0 : i64, tpu.core_type = #tpu.core_type<tc>, window_params = [{transform_indices = @transform_0, window_bounds = array<i64: 128, 2>}, {pipeline_mode = #tpu.pipeline_mode<synchronous>, transform_indices = @transform_1, window_bounds = array<i64: 256, 16>}, {pipeline_mode = #tpu.pipeline_mode<synchronous>, transform_indices = @transform_2, window_bounds = array<i64: 2, 16, 128>}, {pipeline_mode = #tpu.pipeline_mode<synchronous>, transform_indices = @transform_3, window_bounds = array<i64: 1, 128>}, {pipeline_mode = #tpu.pipeline_mode<synchronous>, transform_indices = @transform_4, window_bounds = array<i64: 128, 256>}, {pipeline_mode = #tpu.pipeline_mode<synchronous>, transform_indices = @transform_5, window_bounds = array<i64: 1, 256>}, {transform_indices = @transform_6, window_bounds = array<i64: 128, 256>}]} {
    %c0 = arith.constant 0 : index
    %c0_0 = arith.constant 0 : index
    %0 = vector.load %arg1[%c0, %c0_0] : memref<128x2xi32, #tpu.memory_space<vmem>>, vector<128x2xi32>
    %c0_1 = arith.constant 0 : index
    %c0_2 = arith.constant 0 : index
    %1 = vector.load %arg2[%c0_1, %c0_2] : memref<256x16xf32, #tpu.memory_space<vmem>>, vector<256x16xf32>
    %2 = tpu.iota {dimensions = array<i32: 1>} : vector<128x256xi32>
    %cst = arith.constant 0.000000e+00 : f32
    %3 = vector.broadcast %cst : f32 to vector<128x128xf32>
    %4 = vector.extract_strided_slice %0 {offsets = [0, 0], sizes = [128, 1], strides = [1, 1]} : vector<128x2xi32> to vector<128x1xi32>
    %5 = vector.broadcast %4 : vector<128x1xi32> to vector<128x256xi32>
    %6 = arith.cmpi eq, %2, %5 : vector<128x256xi32>
    %7 = arith.extui %6 : vector<128x256xi1> to vector<128x256xi32>
    %8 = arith.sitofp %7 : vector<128x256xi32> to vector<128x256xf32>
    %cst_3 = arith.constant dense<0.000000e+00> : vector<128x16xf32>
    %9 = tpu.matmul %8, %1, %cst_3 {dimension_numbers = #tpu.dot_dimension_numbers<[1], [0], [0], [1], [0, 0, 1, 1], [], []>} : vector<128x256xf32>, vector<256x16xf32>, vector<128x16xf32> -> vector<128x16xf32>
    %c0_4 = arith.constant 0 : index
    %c0_5 = arith.constant 0 : index
    %c0_6 = arith.constant 0 : index
    %10 = vector.load %arg3[%c0_4, %c0_5, %c0_6] : memref<2x16x128xf32, #tpu.memory_space<vmem>>, vector<1x16x128xf32>
    %11 = vector.shape_cast %10 : vector<1x16x128xf32> to vector<16x128xf32>
    %cst_7 = arith.constant dense<0.000000e+00> : vector<128x128xf32>
    %12 = tpu.matmul %9, %11, %cst_7 {dimension_numbers = #tpu.dot_dimension_numbers<[1], [0], [0], [1], [0, 0, 1, 1], [], []>} : vector<128x16xf32>, vector<16x128xf32>, vector<128x128xf32> -> vector<128x128xf32>
    %13 = arith.addf %3, %12 : vector<128x128xf32>
    %14 = vector.extract_strided_slice %0 {offsets = [0, 1], sizes = [128, 1], strides = [1, 1]} : vector<128x2xi32> to vector<128x1xi32>
    %15 = vector.broadcast %14 : vector<128x1xi32> to vector<128x256xi32>
    %16 = arith.cmpi eq, %2, %15 : vector<128x256xi32>
    %17 = arith.extui %16 : vector<128x256xi1> to vector<128x256xi32>
    %18 = arith.sitofp %17 : vector<128x256xi32> to vector<128x256xf32>
    %cst_8 = arith.constant dense<0.000000e+00> : vector<128x16xf32>
    %19 = tpu.matmul %18, %1, %cst_8 {dimension_numbers = #tpu.dot_dimension_numbers<[1], [0], [0], [1], [0, 0, 1, 1], [], []>} : vector<128x256xf32>, vector<256x16xf32>, vector<128x16xf32> -> vector<128x16xf32>
    %c1 = arith.constant 1 : index
    %c0_9 = arith.constant 0 : index
    %c0_10 = arith.constant 0 : index
    %20 = vector.load %arg3[%c1, %c0_9, %c0_10] : memref<2x16x128xf32, #tpu.memory_space<vmem>>, vector<1x16x128xf32>
    %21 = vector.shape_cast %20 : vector<1x16x128xf32> to vector<16x128xf32>
    %cst_11 = arith.constant dense<0.000000e+00> : vector<128x128xf32>
    %22 = tpu.matmul %19, %21, %cst_11 {dimension_numbers = #tpu.dot_dimension_numbers<[1], [0], [0], [1], [0, 0, 1, 1], [], []>} : vector<128x16xf32>, vector<16x128xf32>, vector<128x128xf32> -> vector<128x128xf32>
    %23 = arith.addf %13, %22 : vector<128x128xf32>
    %c0_12 = arith.constant 0 : index
    %c0_13 = arith.constant 0 : index
    %24 = vector.load %arg4[%c0_12, %c0_13] : memref<1x128xf32, #tpu.memory_space<vmem>>, vector<1x128xf32>
    %25 = vector.broadcast %24 : vector<1x128xf32> to vector<128x128xf32>
    %26 = arith.addf %23, %25 : vector<128x128xf32>
    %cst_14 = arith.constant 0.000000e+00 : f32
    %27 = vector.broadcast %cst_14 : f32 to vector<128x128xf32>
    %28 = arith.maximumf %26, %27 : vector<128x128xf32>
    %c0_15 = arith.constant 0 : index
    %c0_16 = arith.constant 0 : index
    %29 = vector.load %arg5[%c0_15, %c0_16] : memref<128x256xf32, #tpu.memory_space<vmem>>, vector<128x256xf32>
    %cst_17 = arith.constant dense<0.000000e+00> : vector<128x256xf32>
    %30 = tpu.matmul %28, %29, %cst_17 {dimension_numbers = #tpu.dot_dimension_numbers<[1], [0], [0], [1], [0, 0, 1, 1], [], []>} : vector<128x128xf32>, vector<128x256xf32>, vector<128x256xf32> -> vector<128x256xf32>
    %c0_18 = arith.constant 0 : index
    %c0_19 = arith.constant 0 : index
    %31 = vector.load %arg6[%c0_18, %c0_19] : memref<1x256xf32, #tpu.memory_space<vmem>>, vector<1x256xf32>
    %32 = vector.broadcast %31 : vector<1x256xf32> to vector<128x256xf32>
    %33 = arith.addf %30, %32 : vector<128x256xf32>
    %cst_20 = arith.constant dense<0xFF800000> : vector<128xf32>
    %34 = vector.multi_reduction <maximumf>, %33, %cst_20 [1] : vector<128x256xf32> to vector<128xf32>
    %35 = vector.shape_cast %34 : vector<128xf32> to vector<128x1xf32>
    %36 = vector.broadcast %35 : vector<128x1xf32> to vector<128x256xf32>
    %37 = arith.subf %33, %36 : vector<128x256xf32>
    %38 = math.exp %37 : vector<128x256xf32>
    %cst_21 = arith.constant dense<0.000000e+00> : vector<128xf32>
    %39 = vector.multi_reduction <add>, %38, %cst_21 [1] : vector<128x256xf32> to vector<128xf32>
    %40 = vector.shape_cast %39 : vector<128xf32> to vector<128x1xf32>
    %41 = math.log %40 : vector<128x1xf32>
    %42 = vector.broadcast %41 : vector<128x1xf32> to vector<128x256xf32>
    %43 = arith.subf %37, %42 : vector<128x256xf32>
    %c0_22 = arith.constant 0 : index
    %c0_23 = arith.constant 0 : index
    %44 = vector.load %arg7[%c0_22, %c0_23] : memref<128x256xf32, #tpu.memory_space<vmem>>, vector<128x256xf32>
    tpu.vector_store %arg7[%c0_22, %c0_23], %43 {strides = array<i32>} : memref<128x256xf32, #tpu.memory_space<vmem>>, vector<128x256xf32>,
    return
  }
  func.func @transform_0(%arg0: i32) -> (i32, i32) {
    %c0_i32 = arith.constant 0 : i32
    %c0_i32_0 = arith.constant 0 : i32
    return %arg0, %c0_i32 : i32, i32
  }
  func.func @transform_1(%arg0: i32) -> (i32, i32) {
    %c0_i32 = arith.constant 0 : i32
    %c0_i32_0 = arith.constant 0 : i32
    %c0_i32_1 = arith.constant 0 : i32
    return %c0_i32, %c0_i32_0 : i32, i32
  }
  func.func @transform_2(%arg0: i32) -> (i32, i32, i32) {
    %c0_i32 = arith.constant 0 : i32
    %c0_i32_0 = arith.constant 0 : i32
    %c0_i32_1 = arith.constant 0 : i32
    %c0_i32_2 = arith.constant 0 : i32
    return %c0_i32, %c0_i32_0, %c0_i32_1 : i32, i32, i32
  }
  func.func @transform_3(%arg0: i32) -> (i32, i32) {
    %c0_i32 = arith.constant 0 : i32
    %c0_i32_0 = arith.constant 0 : i32
    %c0_i32_1 = arith.constant 0 : i32
    return %c0_i32, %c0_i32_0 : i32, i32
  }
  func.func @transform_4(%arg0: i32) -> (i32, i32) {
    %c0_i32 = arith.constant 0 : i32
    %c0_i32_0 = arith.constant 0 : i32
    %c0_i32_1 = arith.constant 0 : i32
    return %c0_i32, %c0_i32_0 : i32, i32
  }
  func.func @transform_5(%arg0: i32) -> (i32, i32) {
    %c0_i32 = arith.constant 0 : i32
    %c0_i32_0 = arith.constant 0 : i32
    %c0_i32_1 = arith.constant 0 : i32
    return %c0_i32, %c0_i32_0 : i32, i32
  }
  func.func @transform_6(%arg0: i32) -> (i32, i32) {
    %c0_i32 = arith.constant 0 : i32
    %c0_i32_0 = arith.constant 0 : i32
    return %arg0, %c0_i32 : i32, i32
  }
}

</mosaic_0001>

<bundles_post_ra>
// kernel: tpu_custom_call.1
= control target key start
LH: loop header
LB: loop body
LE: loop exit
PB: predicated region body
PF: predicated region fallthrough
CT: control target
= control target key end

     0   :  { %11 = vsyncpa [#allocation3], 0  ;;  %s3705_s0 = inlined_call_operand.vmem [shape: s32[256,2], index: 0, kind: input, shape index: {}]   ;;  %s3706_s1 = inlined_call_operand.vmem [shape: f32[256,16], index: 1, kind: input, shape index: {}]   ;;  %s3707_s2 = inlined_call_operand.vmem [shape: f32[2,16,128], index: 2, kind: input, shape index: {}]   ;;  %s3708_s3 = inlined_call_operand.vmem [shape: f32[1,128], index: 3, kind: input, shape index: {}]   ;;  %s3709_s4 = inlined_call_operand.vmem [shape: f32[128,256], index: 4, kind: input, shape index: {}]   ;;  %s3710_s5 = inlined_call_operand.vmem [shape: f32[1,256], index: 5, kind: input, shape index: {}]   ;;  %s3711_s6 = inlined_call_operand.hbm [shape: f32[256,256], index: 6, kind: output, shape index: {}]  }
   0x1   :  { %13 = vsyncpa [#allocation3 + $0x1], 0  ;;  %s2594_s21 = smov 0   ;;  %s2596_s22 = smov 0  }
   0x2   :  { %s2598_s23 = smov 0   ;;  %s2600_s24 = smov 0  }
   0x3 LB: > { %s2615_s25 = sadd.s32 4294967295, %s2550_s24   ;;  %s1883_s26 = sadd.s32 4294967294, %s2550_s24   ;;  %s2550_s24 = sphi %s2600_s24, %s3717_s24   ;;  %s2546_s23 = sphi %s2598_s23, %s3716_s23   ;;  %s2542_s22 = sphi %s2596_s22, %s3715_s22   ;;  %s2538_s21 = sphi %s2594_s21, %s3714_s21  }
   0x4   : > { %s2619_s27 = sadd.s32 1, %s2550_s24   ;;  %s157_s28 = sadd.s32 1, %s2546_s23 }
   0x5   : > { %s154_s29 = ssub.s32 %s2550_s24, %s2619_s27  ;;  %p167_p0 = scmp.ne.s32.totalorder %s2546_s23, %s2542_s22 }
   0x6   : > { %p155_p1 = scmp.eq.s32.totalorder %s154_s29, 0  ;;  %p168_p2 = scmp.eq.s32.totalorder %s2615_s25, 1 }
   0x7   : > { %p173_p3 = scmp.ne.s32.totalorder %s2542_s22, %s2538_s21  ;;  %p174_p4 = scmp.eq.s32.totalorder %s1883_s26, 1 }
   0x8   : > { %s2630_s30 = scalar_select %p155_p1, %s2546_s23, %s157_s28  }
   0x9   : > { %p2632_p5 = por %p168_p2, %p167_p0  ;;  %p2636_p6 = por %p174_p4, %p173_p3 }
   0xa   : > { %p1886_p7 = scmp.ge.s32.totalorder %s2550_s24, 1  ;;  %p216_p8 = scmp.lt.s32.totalorder %s2550_s24, 3 }
   0xc   : > { %p217_p9 = pnand %p1886_p7, %p216_p8 }
   0xd   : > { %s1888_s9 = sshll.u32 (!%p217_p9), %s2615_s25, 4  ;;  %s243_s26 = sand.u32 (!%p217_p9), 1, %s2542_s22  }
   0xe   : > { %220 = sbr.rel (%p217_p9) target bundleno = 1176 (0x498), region = 44  ;;  %p247_p10 = scmp.lt.s32.totalorder (!%p217_p9), %s1888_s9, 31 }
   0xf   : > { %s2060_s10 = sshll.u32 (!%p217_p9), %s2615_s25, 12  ;;  %s3665_s25 = scalar_lea.sflag (!%p217_p9), [#allocation3], %s243_s26 }
  0x10   : > { %s3655_s14 = scalar_lea.hbm (!%p217_p9), %s3711_s6, %s2060_s10  ;;  %s2556_s16 = smov (!%p217_p9), [#allocation2]  }
  0x11   : > { %s2494_s17 = sshll.u32 (!%p217_p9), %s2556_s16, 4  ;;  %s2495_s17 = int_to_ptr.vmem [resolvable:$false] %s2494_s17 }
  0x12   : > { %s2496_s18 = scalar_lea.vmem (!%p217_p9), %s2495_s17, 8192 }
  0x13   : > { %v2646_v0 = vld [vmem:[%s3706_s1 + $0xf8] sm:$0xff]  ;;  %v2552_v2 = vmov 0   ;;  %v2656_v3 = vld [vmem:[%s3706_s1 + $0xf0] sm:$0xff]  ;;  %s3719_s9 = smov (!%p247_p10, %s1888_s9), 31  ;;  %v2669_v5 = vld [vmem:[%s3706_s1 + $0xe8] sm:$0xff]  ;;  %v2553_v30 = vmov 1   ;;  %v301_v50 = vlaneseq }
  0x14   : > { %v2651_v1 = vld [vmem:[%s3706_s1 + $0x78] sm:$0xff]  ;;  %2391 = vset.pattern.permute.xlu1 %v2552_v2  ;;  %2390 = vset.pattern.permute.xlu0 %v2552_v2  ;;  %v2662_v4 = vld [vmem:[%s3706_s1 + $0x70] sm:$0xff]  ;;  %v2676_v6 = vld [vmem:[%s3706_s1 + $0x68] sm:$0xff]  ;;  %s1889_s28 = sshll.u32 %s3719_s9, 3  ;;  %v2554_v55 = vmov 1.0  }
  0x15   : > { %2313 = vmatprep.subr.mxu1 %v2646_v0  ;;  %2061 = vmatprep.subr.mxu0 %v2646_v0  ;;  %s2684_s11 = scalar_lea.vmem %s3705_s0, %s1889_s28  ;;  %v2690_v7 = vld [vmem:[%s3706_s1 + $0xe0] sm:$0xff]  ;;  %v2711_v11 = vld [vmem:[%s3706_s1 + $0xd8] sm:$0xff]  ;;  %v2732_v15 = vld [vmem:[%s3706_s1 + $0xd0] sm:$0xff]  ;;  %v2924_v51 = vand.u32 127, %v301_v50  ;;  %s1887_s28 = sshll.u32 %s243_s26, 8 }
  0x16   : > { %2329 = vmatpush3.msra.mxu1 %v2651_v1  ;;  %2062 = vmatpush3.msra.mxu0 %v2651_v1  ;;  %v2694_v8 = vld [vmem:[%s2684_s11 + $0x50] sm:$0xff]  ;;  %v2697_v9 = vld [vmem:[%s2684_s11 + $0x40] sm:$0xff]  ;;  %v2714_v12 = vld [vmem:[%s2684_s11 + $0x58] sm:$0xff]  ;;  %s3590_s29 = scalar_lea.vmem [#allocation2], %s1887_s28 }
  0x17   : > { %2314 = vmatprep.subr.mxu1 %v2656_v3  ;;  %2063 = vmatprep.subr.mxu0 %v2656_v3  ;;  %v2703_v10 = vld [vmem:[%s3706_s1 + $0x60] sm:$0xff]  ;;  %v2717_v13 = vld [vmem:[%s2684_s11 + $0x48] sm:$0xff]  ;;  %v2725_v14 = vld [vmem:[%s3706_s1 + $0x58] sm:$0xff]  ;;  %v2927_v52 = vadd.s32 128, %v2924_v51  ;;  %s1821_s12 = sshll.u32 %s3590_s29, 4  ;;  %s3657_s12 = int_to_ptr.vmem [resolvable:$true] %s1821_s12 }
  0x18   : > { %2330 = vmatpush3.msra.mxu1 %v2662_v4  ;;  %2064 = vmatpush3.msra.mxu0 %v2662_v4  ;;  %v2740_v16 = vld [vmem:[%s3706_s1 + $0x50] sm:$0xff]  ;;  %v2743_v17 = vld [vmem:[%s2684_s11 + $0x68] sm:$0xff]  ;;  %v2746_v18 = vld [vmem:[%s2684_s11 + $0x60] sm:$0xff]  ;;  %s2490_s15 = scalar_lea.vmem %s3657_s12, 4096  ;;  %p2497_p0 = scmp.lt.s32.totalorder %s3657_s12, %s2495_s17 }
  0x19   : > { %2315 = vmatprep.subr.mxu1 %v2669_v5  ;;  %2065 = vmatprep.subr.mxu0 %v2669_v5  ;;  %v2754_v19 = vld [vmem:[%s3706_s1 + $0xc8] sm:$0xff]  ;;  %v2769_v21 = vld [vmem:[%s3706_s1 + $0xc0] sm:$0xff]  ;;  %v2772_v22 = vld [vmem:[%s2684_s11 + $0x78] sm:$0xff]  ;;  %p2491_p11 = scmp.ne.s32.totalorder %s3657_s12, %s2490_s15  ;;  %p2498_p1 = scmp.lt.s32.totalorder %s2496_s18, %s2490_s15 }
  0x1a   : > { %2331 = vmatpush3.msra.mxu1 %v2676_v6  ;;  %2066 = vmatpush3.msra.mxu0 %v2676_v6  ;;  %v2761_v20 = vld [vmem:[%s3706_s1 + $0x48] sm:$0xff]  ;;  %v2775_v23 = vld [vmem:[%s2684_s11 + $0x70] sm:$0xff]  ;;  %v2783_v24 = vld [vmem:[%s3706_s1 + $0x40] sm:$0xff] }
  0x1b   : > { %335 = vperm.xlu1 %2391, %v2694_v8   ;;  %329 = vperm.xlu0 %2390, %v2697_v9   ;;  %v2790_v25 = vld [vmem:[%s3706_s1 + $0xb8] sm:$0xff]  ;;  %v253_v27 = vld [vmem:[%s2684_s11] sm:$0xff]  ;;  %v2807_v28 = vld [vmem:[%s3706_s1 + $0xb0] sm:$0xff]  ;;  %p2492_p12 = pnand %p2491_p11, %p2632_p5  ;;  %p2499_p2 = por %p2498_p1, %p2497_p0 }
  0x1c   : > { %2316 = vmatprep.subr.mxu1 %v2690_v7  ;;  %2067 = vmatprep.subr.mxu0 %v2690_v7  ;;  %v2798_v26 = vld [vmem:[%s3706_s1 + $0x38] sm:$0xff]  ;;  %v2814_v29 = vld [vmem:[%s3706_s1 + $0x30] sm:$0xff]  ;;  %v2821_v31 = vld [vmem:[%s3706_s1 + $0xa8] sm:$0xff] }
  0x1d   : > { %2332 = vmatpush3.msra.mxu1 %v2703_v10  ;;  %2068 = vmatpush3.msra.mxu0 %v2703_v10  ;;  %v254_v32 = vld [vmem:[%s2684_s11 + $0x8] sm:$0xff]  ;;  %v2834_v34 = vld [vmem:[%s3706_s1 + $0xa0] sm:$0xff]  ;;  %v2848_v36 = vld [vmem:[%s3706_s1 + $0x98] sm:$0xff]  ;;  %p2493_p13 = pneg %p2492_p12 }
  0x1e   : > { %2317 = vmatprep.subr.mxu1 %v2711_v11  ;;  %2069 = vmatprep.subr.mxu0 %v2711_v11  ;;  %v2828_v33 = vld [vmem:[%s3706_s1 + $0x28] sm:$0xff]  ;;  %v2841_v35 = vld [vmem:[%s3706_s1 + $0x20] sm:$0xff]  ;;  %v255_v37 = vld [vmem:[%s2684_s11 + $0x10] sm:$0xff] }
  0x1f   : > { %338 = vperm.xlu1 %2391, %v2714_v12   ;;  %332 = vperm.xlu0 %2390, %v2717_v13   ;;  %v2855_v38 = vld [vmem:[%s3706_s1 + $0x18] sm:$0xff]  ;;  %v2861_v39 = vld [vmem:[%s3706_s1 + $0x90] sm:$0xff]  ;;  %v2875_v41 = vld [vmem:[%s3706_s1 + $0x88] sm:$0xff]  ;;  %p2500_p3 = pnand %p2499_p2, %p2493_p13 }
  0x20   : > { %2333 = vmatpush3.msra.mxu1 %v2725_v14  ;;  %2070 = vmatpush3.msra.mxu0 %v2725_v14  ;;  %v2868_v40 = vld [vmem:[%s3706_s1 + $0x10] sm:$0xff]  ;;  %v256_v42 = vld [vmem:[%s2684_s11 + $0x18] sm:$0xff]  ;;  %v2882_v43 = vld [vmem:[%s3706_s1 + $0x8] sm:$0xff] }
  0x21   : > { %2318 = vmatprep.subr.mxu1 %v2732_v15  ;;  %2071 = vmatprep.subr.mxu0 %v2732_v15  ;;  %v2888_v44 = vld [vmem:[%s3706_s1 + $0x80] sm:$0xff]  ;;  %v258_v47 = vld [vmem:[%s2684_s11 + $0x28] sm:$0xff]  ;;  %v259_v48 = vld [vmem:[%s2684_s11 + $0x30] sm:$0xff] }
  0x22   : > { %2334 = vmatpush3.msra.mxu1 %v2740_v16  ;;  %2072 = vmatpush3.msra.mxu0 %v2740_v16  ;;  %v2895_v45 = vld [vmem:[%s3706_s1] sm:$0xff]  ;;  %v260_v49 = vld [vmem:[%s2684_s11 + $0x38] sm:$0xff] }
  0x23   : > { %344 = vperm.xlu1 %2391, %v2743_v17   ;;  %341 = vperm.xlu0 %2390, %v2746_v18   ;;  %v257_v46 = vld [vmem:[%s2684_s11 + $0x20] sm:$0xff] }
  0x24   : > { %2319 = vmatprep.subr.mxu1 %v2754_v19  ;;  %2073 = vmatprep.subr.mxu0 %v2754_v19 }
  0x25   : > { %2335 = vmatpush3.msra.mxu1 %v2761_v20  ;;  %2074 = vmatpush3.msra.mxu0 %v2761_v20 }
  0x26   : > { %2320 = vmatprep.subr.mxu1 %v2769_v21  ;;  %2075 = vmatprep.subr.mxu0 %v2769_v21 }
  0x27   : > { %350 = vperm.xlu1 %2391, %v2772_v22   ;;  %347 = vperm.xlu0 %2390, %v2775_v23  }
  0x28   : > { %2336 = vmatpush3.msra.mxu1 %v2783_v24  ;;  %2076 = vmatpush3.msra.mxu0 %v2783_v24 }
  0x29   : > { %2321 = vmatprep.subr.mxu1 %v2790_v25  ;;  %2077 = vmatprep.subr.mxu0 %v2790_v25 }
  0x2a   : > { %2337 = vmatpush3.msra.mxu1 %v2798_v26  ;;  %2078 = vmatpush3.msra.mxu0 %v2798_v26 }
  0x2b   : > { %2392 = vset.pattern.permute.xlu1 %v2553_v30  ;;  %305 = vperm.xlu0 %2390, %v253_v27  }
  0x2c   : > { %596 = vperm.xlu1 %2392, %v253_v27   ;;  %2322 = vmatprep.subr.mxu1 %v2807_v28 }
  0x2d   : > { %2338 = vmatpush3.msra.mxu1 %v2814_v29  ;;  %2079 = vmatprep.subr.mxu0 %v2807_v28 }
  0x2e   : > { %2323 = vmatprep.subr.mxu1 %v2821_v31  ;;  %2080 = vmatpush3.msra.mxu0 %v2814_v29 }
  0x2f   : > { %308 = vperm.xlu0 %2390, %v254_v32   ;;  %2339 = vmatpush3.msra.mxu1 %v2828_v33 }
  0x30   : > { %599 = vperm.xlu1 %2392, %v254_v32   ;;  %2324 = vmatprep.subr.mxu1 %v2834_v34 }
  0x31   : > { %2340 = vmatpush3.msra.mxu1 %v2841_v35  ;;  %2081 = vmatprep.subr.mxu0 %v2821_v31 }
  0x32   : > { %2325 = vmatprep.subr.mxu1 %v2848_v36  ;;  %2082 = vmatpush3.msra.mxu0 %v2828_v33 }
  0x33   : > { %311 = vperm.xlu0 %2390, %v255_v37   ;;  %2341 = vmatpush3.msra.mxu1 %v2855_v38 }
  0x34   : > { %602 = vperm.xlu1 %2392, %v255_v37   ;;  %2326 = vmatprep.subr.mxu1 %v2861_v39 }
  0x35   : > { %2342 = vmatpush3.msra.mxu1 %v2868_v40  ;;  %2083 = vmatprep.subr.mxu0 %v2834_v34 }
  0x36   : > { %2327 = vmatprep.subr.mxu1 %v2875_v41  ;;  %2084 = vmatpush3.msra.mxu0 %v2841_v35 }
  0x37   : > { %314 = vperm.xlu0 %2390, %v256_v42   ;;  %2343 = vmatpush3.msra.mxu1 %v2882_v43 }
  0x38   : > { %605 = vperm.xlu1 %2392, %v256_v42   ;;  %2328 = vmatprep.subr.mxu1 %v2888_v44 }
  0x39   : > { %2344 = vmatpush3.msra.mxu1 %v2895_v45  ;;  %2085 = vmatprep.subr.mxu0 %v2848_v36 }
  0x3a   : > { %2141 = vmatprep.subr.mxu1 %v2646_v0  ;;  %2086 = vmatpush3.msra.mxu0 %v2855_v38 }
  0x3b   : > { %317 = vperm.xlu0 %2390, %v257_v46   ;;  %2087 = vmatprep.subr.mxu0 %v2861_v39 }
  0x3c   : > { %608 = vperm.xlu1 %2392, %v257_v46   ;;  %2088 = vmatpush3.msra.mxu0 %v2868_v40 }
  0x3d   : > { %2089 = vmatprep.subr.mxu0 %v2875_v41 }
  0x3e   : > { %2090 = vmatpush3.msra.mxu0 %v2882_v43 }
  0x3f   : > { %320 = vperm.xlu0 %2390, %v258_v47   ;;  %2091 = vmatprep.subr.mxu0 %v2888_v44 }
  0x40   : > { %611 = vperm.xlu1 %2392, %v258_v47   ;;  %2092 = vmatpush3.msra.mxu0 %v2895_v45 }
  0x43   : > { %323 = vperm.xlu0 %2390, %v259_v48  }
  0x44   : > { %614 = vperm.xlu1 %2392, %v259_v48  }
  0x47   : > { %326 = vperm.xlu0 %2390, %v260_v49  }
  0x48   : > { %617 = vperm.xlu1 %2392, %v260_v49  }
  0x4b   : > { %2393 = vset.pattern.permute.xlu0 %v2553_v30 }
  0x4c   : > { %623 = vperm.xlu1 %2392, %v2717_v13   ;;  %620 = vperm.xlu0 %2393, %v2697_v9  }
  0x50   : > { %626 = vperm.xlu1 %2392, %v2694_v8   ;;  %629 = vperm.xlu0 %2393, %v2714_v12  }
  0x54   : > { %632 = vperm.xlu1 %2392, %v2746_v18   ;;  %635 = vperm.xlu0 %2393, %v2743_v17  }
  0x58   : > { %638 = vperm.xlu1 %2392, %v2775_v23   ;;  %641 = vperm.xlu0 %2393, %v2772_v22  }
  0x96   : > { %v336_v53 = vpop.permute.xlu1 %335  ;;  %v330_v54 = vpop.permute.xlu0 %329 }
  0x97   : > { %vm368_vm0 = vcmp.eq.s32.totalorder %v2924_v51, %v330_v54  ;;  %vm369_vm1 = vcmp.eq.s32.totalorder %v2927_v52, %v330_v54  ;;  %vm373_vm2 = vcmp.eq.s32.totalorder %v2927_v52, %v336_v53  ;;  %vm372_vm5 = vcmp.eq.s32.totalorder %v2924_v51, %v336_v53 }
  0x98   : > { %1938 = vmatprep.mubr.msk.f32.mxu1 %vm369_vm1, %v2554_v55 }
  0x99   : > { %1939 = vmatmul.mubr.msk.f32.vlgmr.msra.gmra.mxu1 %vm368_vm0, %v2554_v55 }
  0x9a   : > { %2142 = vmatpush3.msra.mxu1 %v2651_v1  ;;  %v339_v56 = vpop.permute.xlu1 %338  ;;  %v333_v57 = vpop.permute.xlu0 %332 }
  0x9b   : > { %2143 = vmatprep.subr.mxu1 %v2656_v3  ;;  %vm370_vm3 = vcmp.eq.s32.totalorder %v2924_v51, %v333_v57  ;;  %vm371_vm4 = vcmp.eq.s32.totalorder %v2927_v52, %v333_v57  ;;  %vm375_vm6 = vcmp.eq.s32.totalorder %v2927_v52, %v339_v56  ;;  %vm374_vm7 = vcmp.eq.s32.totalorder %v2924_v51, %v339_v56 }
  0x9c   : > { %2144 = vmatpush3.msra.mxu1 %v2662_v4  ;;  %1940 = vmatprep.mubr.msk.f32.mxu1 %vm371_vm4, %v2554_v55 }
  0x9d   : > { %2145 = vmatprep.subr.mxu1 %v2669_v5  ;;  %1941 = vmatmul.mubr.msk.f32.gmra.mxu1 %vm370_vm3, %v2554_v55 }
  0x9e   : > { %2146 = vmatpush3.msra.mxu1 %v2676_v6  ;;  %v345_v58 = vpop.permute.xlu1 %344  ;;  %v342_v59 = vpop.permute.xlu0 %341  ;;  %1942 = vmatprep.mubr.msk.f32.mxu1 %vm373_vm2, %v2554_v55 }
  0x9f   : > { %2147 = vmatprep.subr.mxu1 %v2690_v7  ;;  %vm377_vm8 = vcmp.eq.s32.totalorder %v2927_v52, %v342_v59  ;;  %vm376_vm11 = vcmp.eq.s32.totalorder %v2924_v51, %v342_v59  ;;  %vm379_vm12 = vcmp.eq.s32.totalorder %v2927_v52, %v345_v58  ;;  %vm378_vm15 = vcmp.eq.s32.totalorder %v2924_v51, %v345_v58  ;;  %v594_v7 = vld [vmem:[%s3707_s2 + $0x8] sm:$0xff] }
  0xa0   : > { %2148 = vmatpush3.msra.mxu1 %v2703_v10 }
  0xa1   : > { %2149 = vmatprep.subr.mxu1 %v2711_v11  ;;  %1943 = vmatmul.mubr.msk.f32.gmra.mxu1 %vm372_vm5, %v2554_v55 }
  0xa2   : > { %2150 = vmatpush3.msra.mxu1 %v2725_v14  ;;  %v2951_v60 = vpop.permute.xlu1 %350  ;;  %1944 = vmatprep.mubr.msk.f32.mxu1 %vm375_vm6, %v2554_v55  ;;  %v348_v61 = vpop.permute.xlu0 %347 }
  0xa3   : > { %2151 = vmatprep.subr.mxu1 %v2732_v15  ;;  %vm381_vm0 = vcmp.eq.s32.totalorder %v2927_v52, %v348_v61  ;;  %vm380_vm3 = vcmp.eq.s32.totalorder %v2924_v51, %v348_v61  ;;  %vm383_vm4 = vcmp.eq.s32.totalorder %v2927_v52, %v2951_v60 }
  0xa4   : > { %2152 = vmatpush3.msra.mxu1 %v2740_v16 }
  0xa5   : > { %2153 = vmatprep.subr.mxu1 %v2754_v19  ;;  %1945 = vmatmul.mubr.msk.f32.gmra.mxu1 %vm374_vm7, %v2554_v55  ;;  %v2019_v19 = vld [vmem:[%s3707_s2 + $0x18] sm:$0xff] }
  0xa6   : > { %2154 = vmatpush3.msra.mxu1 %v2761_v20  ;;  %1946 = vmatprep.mubr.msk.f32.mxu1 %vm377_vm8, %v2554_v55  ;;  %v306_v62 = vpop.permute.xlu0 %305  ;;  %vm382_vm8 = vcmp.eq.s32.totalorder %v2924_v51, %v2951_v60  ;;  %v593_v20 = vld [vmem:[%s3707_s2] sm:$0xff] }
  0xa7   : > { %2155 = vmatprep.subr.mxu1 %v2769_v21  ;;  %vm352_vm9 = vcmp.eq.s32.totalorder %v2924_v51, %v306_v62  ;;  %v2964_v63 = vpop.permute.xlu1 %596  ;;  %vm353_vm10 = vcmp.eq.s32.totalorder %v2927_v52, %v306_v62  ;;  %2257 = vmatprep.subr.mxu0 %v2019_v19 }
  0xa8   : > { %2156 = vmatpush3.msra.mxu1 %v2783_v24  ;;  %1922 = vmatprep.mubr.msk.f32.mxu0 %vm353_vm10, %v2554_v55  ;;  %vm644_vm7 = vcmp.eq.s32.totalorder %v2927_v52, %v2964_v63 }
  0xa9   : > { %2157 = vmatprep.subr.mxu1 %v2790_v25  ;;  %1923 = vmatmul.mubr.msk.f32.vlgmr.msra.gmra.mxu0 %vm352_vm9, %v2554_v55  ;;  %vm643_vm9 = vcmp.eq.s32.totalorder %v2924_v51, %v2964_v63  ;;  %v2018_v25 = vld [vmem:[%s3707_s2 + $0x10] sm:$0xff] }
  0xaa   : > { %1947 = vmatmul.mubr.msk.f32.gmra.mxu1 %vm376_vm11, %v2554_v55  ;;  %v309_v0 = vpop.permute.xlu0 %308  ;;  %2258 = vmatpush3.msra.mxu0 %v2019_v19  ;;  %v1337_v19 = vld [vmem:[%s3709_s4 + $0xc0] sm:$0xff] }
  0xab   : > { %2158 = vmatpush3.msra.mxu1 %v2798_v26  ;;  %1948 = vmatprep.mubr.msk.f32.mxu1 %vm379_vm12, %v2554_v55  ;;  %vm354_vm13 = vcmp.eq.s32.totalorder %v2924_v51, %v309_v0  ;;  %vm355_vm14 = vcmp.eq.s32.totalorder %v2927_v52, %v309_v0  ;;  %v600_v1 = vpop.permute.xlu1 %599  ;;  %v1344_v26 = vld [vmem:[%s3709_s4 + $0xf8] sm:$0xff] }
  0xac   : > { %2159 = vmatprep.subr.mxu1 %v2807_v28  ;;  %1924 = vmatprep.mubr.msk.f32.mxu0 %vm355_vm14, %v2554_v55  ;;  %vm646_vm12 = vcmp.eq.s32.totalorder %v2927_v52, %v600_v1 }
  0xad   : > { %2160 = vmatpush3.msra.mxu1 %v2814_v29  ;;  %1925 = vmatmul.mubr.msk.f32.gmra.mxu0 %vm354_vm13, %v2554_v55 }
  0xae   : > { %2161 = vmatprep.subr.mxu1 %v2821_v31  ;;  %1949 = vmatmul.mubr.msk.f32.gmra.mxu1 %vm378_vm15, %v2554_v55  ;;  %v312_v2 = vpop.permute.xlu0 %311  ;;  %vm645_vm15 = vcmp.eq.s32.totalorder %v2924_v51, %v600_v1 }
  0xaf   : > { %2162 = vmatpush3.msra.mxu1 %v2828_v33  ;;  %1950 = vmatprep.mubr.msk.f32.mxu1 %vm381_vm0, %v2554_v55  ;;  %vm356_vm1 = vcmp.eq.s32.totalorder %v2924_v51, %v312_v2  ;;  %vm357_vm2 = vcmp.eq.s32.totalorder %v2927_v52, %v312_v2  ;;  %v603_v3 = vpop.permute.xlu1 %602 }
  0xb0   : > { %2163 = vmatprep.subr.mxu1 %v2834_v34  ;;  %1926 = vmatprep.mubr.msk.f32.mxu0 %vm357_vm2, %v2554_v55  ;;  %vm648_vm0 = vcmp.eq.s32.totalorder %v2927_v52, %v603_v3 }
  0xb1   : > { %2164 = vmatpush3.msra.mxu1 %v2841_v35  ;;  %1927 = vmatmul.mubr.msk.f32.gmra.mxu0 %vm356_vm1, %v2554_v55 }
  0xb2   : > { %2165 = vmatprep.subr.mxu1 %v2848_v36  ;;  %1951 = vmatmul.mubr.msk.f32.gmra.mxu1 %vm380_vm3, %v2554_v55  ;;  %v315_v4 = vpop.permute.xlu0 %314  ;;  %vm647_vm3 = vcmp.eq.s32.totalorder %v2924_v51, %v603_v3 }
  0xb3   : > { %2166 = vmatpush3.msra.mxu1 %v2855_v38  ;;  %1952 = vmatprep.mubr.msk.f32.mxu1 %vm383_vm4, %v2554_v55  ;;  %vm358_vm5 = vcmp.eq.s32.totalorder %v2924_v51, %v315_v4  ;;  %vm359_vm6 = vcmp.eq.s32.totalorder %v2927_v52, %v315_v4  ;;  %v606_v6 = vpop.permute.xlu1 %605 }
  0xb4   : > { %2167 = vmatprep.subr.mxu1 %v2861_v39  ;;  %1928 = vmatprep.mubr.msk.f32.mxu0 %vm359_vm6, %v2554_v55  ;;  %vm650_vm4 = vcmp.eq.s32.totalorder %v2927_v52, %v606_v6 }
  0xb5   : > { %2168 = vmatpush3.msra.mxu1 %v2868_v40  ;;  %1929 = vmatmul.mubr.msk.f32.gmra.mxu0 %vm358_vm5, %v2554_v55 }
  0xb6   : > { %2169 = vmatprep.subr.mxu1 %v2875_v41  ;;  %1953 = vmatmul.mubr.msk.f32.gmra.mxu1 %vm382_vm8, %v2554_v55  ;;  %v318_v5 = vpop.permute.xlu0 %317 }
  0xb7   : > { %2170 = vmatpush3.msra.mxu1 %v2882_v43  ;;  %vm360_vm10 = vcmp.eq.s32.totalorder %v2924_v51, %v318_v5  ;;  %vm361_vm11 = vcmp.eq.s32.totalorder %v2927_v52, %v318_v5  ;;  %1986 = vmatprep.mubr.msk.f32.mxu1 %vm644_vm7, %v2554_v55  ;;  %v609_v9 = vpop.permute.xlu1 %608  ;;  %vm649_vm7 = vcmp.eq.s32.totalorder %v2924_v51, %v606_v6  ;;  %v1343_v5 = vld [vmem:[%s3709_s4 + $0xf0] sm:$0xff] }
  0xb8   : > { %2171 = vmatprep.subr.mxu1 %v2888_v44  ;;  %1930 = vmatprep.mubr.msk.f32.mxu0 %vm361_vm11, %v2554_v55  ;;  %vm652_vm8 = vcmp.eq.s32.totalorder %v2927_v52, %v609_v9 }
  0xb9   : > { %2172 = vmatpush3.msra.mxu1 %v2895_v45  ;;  %1931 = vmatmul.mubr.msk.f32.gmra.mxu0 %vm360_vm10, %v2554_v55 }
  0xba   : > { %1987 = vmatmul.mubr.msk.f32.vlgmr.msra.gmra.mxu1 %vm643_vm9, %v2554_v55  ;;  %v321_v8 = vpop.permute.xlu0 %320  ;;  %2285 = vmatprep.subr.mxu1 %v594_v7  ;;  %vm651_vm9 = vcmp.eq.s32.totalorder %v2924_v51, %v609_v9  ;;  %v1341_v9 = vld [vmem:[%s3709_s4 + $0xe0] sm:$0xff] }
  0xbb   : > { %1988 = vmatprep.mubr.msk.f32.mxu1 %vm646_vm12, %v2554_v55  ;;  %vm362_vm13 = vcmp.eq.s32.totalorder %v2924_v51, %v321_v8  ;;  %vm363_vm14 = vcmp.eq.s32.totalorder %v2927_v52, %v321_v8  ;;  %2286 = vmatpush3.msra.mxu1 %v594_v7  ;;  %v612_v12 = vpop.permute.xlu1 %611  ;;  %v1342_v7 = vld [vmem:[%s3709_s4 + $0xe8] sm:$0xff] }
  0xbc   : > { %1932 = vmatprep.mubr.msk.f32.mxu0 %vm363_vm14, %v2554_v55  ;;  %vm654_vm10 = vcmp.eq.s32.totalorder %v2927_v52, %v612_v12  ;;  %vm653_vm11 = vcmp.eq.s32.totalorder %v2924_v51, %v612_v12  ;;  %2287 = vmatprep.subr.mxu1 %v593_v20  ;;  %v1340_v12 = vld [vmem:[%s3709_s4 + $0xd8] sm:$0xff] }
  0xbd   : > { %1933 = vmatmul.mubr.msk.f32.gmra.mxu0 %vm362_vm13, %v2554_v55  ;;  %2288 = vmatpush3.msra.mxu1 %v593_v20 }
  0xbe   : > { %1989 = vmatmul.mubr.msk.f32.gmra.mxu1 %vm645_vm15, %v2554_v55  ;;  %v324_v10 = vpop.permute.xlu0 %323  ;;  %2259 = vmatprep.subr.mxu0 %v2018_v25 }
  0xbf   : > { %1990 = vmatprep.mubr.msk.f32.mxu1 %vm648_vm0, %v2554_v55  ;;  %vm364_vm1 = vcmp.eq.s32.totalorder %v2924_v51, %v324_v10  ;;  %vm365_vm2 = vcmp.eq.s32.totalorder %v2927_v52, %v324_v10  ;;  %v615_v13 = vpop.permute.xlu1 %614  ;;  %2260 = vmatpush3.msra.mxu0 %v2018_v25 }
  0xc0   : > { %1934 = vmatprep.mubr.msk.f32.mxu0 %vm365_vm2, %v2554_v55  ;;  %vm656_vm12 = vcmp.eq.s32.totalorder %v2927_v52, %v615_v13  ;;  %vm655_vm13 = vcmp.eq.s32.totalorder %v2924_v51, %v615_v13  ;;  %1357 = vmatprep.subr.mxu0 %v1344_v26 }
  0xc1   : > { %1935 = vmatmul.mubr.msk.f32.gmra.mxu0 %vm364_vm1, %v2554_v55 }
  0xc2   : > { %1991 = vmatmul.mubr.msk.f32.gmra.mxu1 %vm647_vm3, %v2554_v55  ;;  %v327_v11 = vpop.permute.xlu0 %326 }
  0xc3   : > { %1992 = vmatprep.mubr.msk.f32.mxu1 %vm650_vm4, %v2554_v55  ;;  %vm366_vm5 = vcmp.eq.s32.totalorder %v2924_v51, %v327_v11  ;;  %vm367_vm6 = vcmp.eq.s32.totalorder %v2927_v52, %v327_v11  ;;  %v618_v14 = vpop.permute.xlu1 %617 }
  0xc4   : > { %1936 = vmatprep.mubr.msk.f32.mxu0 %vm367_vm6, %v2554_v55  ;;  %vm658_vm14 = vcmp.eq.s32.totalorder %v2927_v52, %v618_v14  ;;  %vm657_vm0 = vcmp.eq.s32.totalorder %v2924_v51, %v618_v14 }
  0xc5   : > { %1937 = vmatmul.mubr.msk.f32.gmra.mxu0 %vm366_vm5, %v2554_v55 }
  0xc6   : > { %1993 = vmatmul.mubr.msk.f32.gmra.mxu1 %vm649_vm7, %v2554_v55 }
  0xc7   : > { %1994 = vmatprep.mubr.msk.f32.mxu1 %vm652_vm8, %v2554_v55  ;;  %v621_v15 = vpop.permute.xlu0 %620  ;;  %v624_v16 = vpop.permute.xlu1 %623 }
  0xc8   : > { %vm660_vm15 = vcmp.eq.s32.totalorder %v2927_v52, %v621_v15  ;;  %vm659_vm1 = vcmp.eq.s32.totalorder %v2924_v51, %v621_v15  ;;  %vm662_vm2 = vcmp.eq.s32.totalorder %v2927_v52, %v624_v16  ;;  %vm661_vm3 = vcmp.eq.s32.totalorder %v2924_v51, %v624_v16  ;;  %v1339_v15 = vld [vmem:[%s3709_s4 + $0xd0] sm:$0xff] }
  0xca   : > { %1995 = vmatmul.mubr.msk.f32.gmra.mxu1 %vm651_vm9, %v2554_v55 }
  0xcb   : > { %1996 = vmatprep.mubr.msk.f32.mxu1 %vm654_vm10, %v2554_v55  ;;  %v627_v17 = vpop.permute.xlu1 %626  ;;  %v630_v18 = vpop.permute.xlu0 %629 }
  0xcc   : > { %vm664_vm4 = vcmp.eq.s32.totalorder %v2927_v52, %v627_v17  ;;  %vm663_vm5 = vcmp.eq.s32.totalorder %v2924_v51, %v627_v17  ;;  %vm666_vm6 = vcmp.eq.s32.totalorder %v2927_v52, %v630_v18  ;;  %vm665_vm7 = vcmp.eq.s32.totalorder %v2924_v51, %v630_v18  ;;  %v1338_v17 = vld [vmem:[%s3709_s4 + $0xc8] sm:$0xff] }
  0xce   : > { %1997 = vmatmul.mubr.msk.f32.gmra.mxu1 %vm653_vm11, %v2554_v55 }
  0xcf   : > { %1998 = vmatprep.mubr.msk.f32.mxu1 %vm656_vm12, %v2554_v55  ;;  %v633_v21 = vpop.permute.xlu1 %632  ;;  %v636_v22 = vpop.permute.xlu0 %635 }
  0xd0   : > { %vm668_vm8 = vcmp.eq.s32.totalorder %v2927_v52, %v633_v21  ;;  %vm667_vm9 = vcmp.eq.s32.totalorder %v2924_v51, %v633_v21  ;;  %vm670_vm10 = vcmp.eq.s32.totalorder %v2927_v52, %v636_v22  ;;  %vm669_vm11 = vcmp.eq.s32.totalorder %v2924_v51, %v636_v22 }
  0xd2   : > { %1999 = vmatmul.mubr.msk.f32.gmra.mxu1 %vm655_vm13, %v2554_v55 }
  0xd3   : > { %2000 = vmatprep.mubr.msk.f32.mxu1 %vm658_vm14, %v2554_v55  ;;  %v639_v23 = vpop.permute.xlu1 %638  ;;  %v642_v24 = vpop.permute.xlu0 %641 }
  0xd4   : > { %vm672_vm12 = vcmp.eq.s32.totalorder %v2927_v52, %v639_v23  ;;  %vm671_vm13 = vcmp.eq.s32.totalorder %v2924_v51, %v639_v23  ;;  %vm674_vm14 = vcmp.eq.s32.totalorder %v2927_v52, %v642_v24 }
  0xd6   : > { %2001 = vmatmul.mubr.msk.f32.gmra.mxu1 %vm657_vm0, %v2554_v55  ;;  %vm887_vm0 = vcmask 130048  }
  0xd7   : > { %2002 = vmatprep.mubr.msk.f32.mxu1 %vm660_vm15, %v2554_v55  ;;  %vm673_vm15 = vcmp.eq.s32.totalorder %v2924_v51, %v642_v24 }
  0xda   : > { %2003 = vmatmul.mubr.msk.f32.gmra.mxu1 %vm659_vm1, %v2554_v55 }
  0xdb   : > { %2004 = vmatprep.mubr.msk.f32.mxu1 %vm662_vm2, %v2554_v55 }
  0xde   : > { %2005 = vmatmul.mubr.msk.f32.gmra.mxu1 %vm661_vm3, %v2554_v55 }
  0xdf   : > { %2006 = vmatprep.mubr.msk.f32.mxu1 %vm664_vm4, %v2554_v55 }
  0xe2   : > { %2007 = vmatmul.mubr.msk.f32.gmra.mxu1 %vm663_vm5, %v2554_v55 }
  0xe3   : > { %2008 = vmatprep.mubr.msk.f32.mxu1 %vm666_vm6, %v2554_v55 }
  0xe6   : > { %2009 = vmatmul.mubr.msk.f32.gmra.mxu1 %vm665_vm7, %v2554_v55 }
  0xe7   : > { %2010 = vmatprep.mubr.msk.f32.mxu1 %vm668_vm8, %v2554_v55 }
  0xea   : > { %2011 = vmatmul.mubr.msk.f32.gmra.mxu1 %vm667_vm9, %v2554_v55 }
  0xeb   : > { %2012 = vmatprep.mubr.msk.f32.mxu1 %vm670_vm10, %v2554_v55 }
  0xee   : > { %2013 = vmatmul.mubr.msk.f32.gmra.mxu1 %vm669_vm11, %v2554_v55 }
  0xef   : > { %2014 = vmatprep.mubr.msk.f32.mxu1 %vm672_vm12, %v2554_v55 }
  0xf2   : > { %2015 = vmatmul.mubr.msk.f32.gmra.mxu1 %vm671_vm13, %v2554_v55 }
  0xf3   : > { %2016 = vmatprep.mubr.msk.f32.mxu1 %vm674_vm14, %v2554_v55 }
  0xf6   : > { %2017 = vmatmul.mubr.msk.f32.gmra.mxu1 %vm673_vm15, %v2554_v55 }
 0x159   : > { %v3111_v27 = vpop.f32.mrf.mxu1 }
 0x15b   : > { %v3113_v28 = vpop.f32.mrf.mxu1 }
 0x15c   : > { %v2119_v22 = vadd.f32 %v3113_v28, %v3111_v27 }
 0x15d   : > { %v3115_v29 = vpop.f32.mrf.mxu1 }
 0x15f   : > { %v3117_v30 = vpop.f32.mrf.mxu1 }
 0x160   : > { %v2122_v25 = vadd.f32 %v3117_v30, %v3115_v29 }
 0x161   : > { %v3119_v31 = vpop.f32.mrf.mxu1 }
 0x163   : > { %v3121_v32 = vpop.f32.mrf.mxu1 }
 0x165   : > { %v3123_v33 = vpop.f32.mrf.mxu1 }
 0x167   : > { %v3125_v34 = vpop.f32.mrf.mxu1 }
 0x168   : > { %v2128_v27 = vadd.f32 %v3125_v34, %v3123_v33 }
 0x169   : > { %v2093_v35 = vpop.f32.mrf.mxu0 }
 0x16a   : > { %v3127_v36 = vpop.f32.mrf.mxu1 }
 0x16b   : > { %v2094_v37 = vpop.f32.mrf.mxu0 }
 0x16c   : > { %v2095_v38 = vadd.f32 %v2094_v37, %v2093_v35  ;;  %v3129_v39 = vpop.f32.mrf.mxu1  ;;  %v2125_v35 = vadd.f32 %v3121_v32, %v3119_v31 }
 0x16d   : > { %v2096_v40 = vpop.f32.mrf.mxu0 }
 0x16e   : > { %v3131_v41 = vpop.f32.mrf.mxu1  ;;  %2289 = vmatprep.mubr.msk.f32.mxu1 %vm887_vm0, %v2095_v38 }
 0x16f   : > { %v2097_v42 = vpop.f32.mrf.mxu0 }
 0x170   : > { %v2098_v43 = vadd.f32 %v2097_v42, %v2096_v40  ;;  %v3134_v44 = vpop.f32.mrf.mxu1  ;;  %v2131_v40 = vadd.f32 %v3129_v39, %v3127_v36 }
 0x171   : > { %v2099_v45 = vpop.f32.mrf.mxu0  ;;  %v2134_v31 = vadd.f32 %v3134_v44, %v3131_v41 }
 0x172   : > { %v3136_v46 = vpop.f32.mrf.mxu1  ;;  %2290 = vmatmul.mubr.msk.f32.vlgmr.msra.gmra.mxu1 %vm887_vm0, %v2098_v43 }
 0x173   : > { %v2100_v47 = vpop.f32.mrf.mxu0 }
 0x174   : > { %v2101_v48 = vadd.f32 %v2100_v47, %v2099_v45  ;;  %v3139_v49 = vpop.f32.mrf.mxu1 }
 0x175   : > { %v2102_v51 = vpop.f32.mrf.mxu0  ;;  %v2137_v42 = vadd.f32 %v3139_v49, %v3136_v46 }
 0x176   : > { %v3141_v52 = vpop.f32.mrf.mxu1  ;;  %2292 = vmatprep.mubr.msk.f32.mxu1 %vm887_vm0, %v2101_v48 }
 0x177   : > { %v2103_v53 = vpop.f32.mrf.mxu0 }
 0x178   : > { %v2104_v54 = vadd.f32 %v2103_v53, %v2102_v51  ;;  %v3144_v55 = vpop.f32.mrf.mxu1 }
 0x179   : > { %v2105_v56 = vpop.f32.mrf.mxu0  ;;  %v2140_v36 = vadd.f32 %v3144_v55, %v3141_v52 }
 0x17a   : > { %v2173_v57 = vpop.f32.mrf.mxu1  ;;  %2293 = vmatmul.mubr.msk.f32.gmra.mxu1 %vm887_vm0, %v2104_v54 }
 0x17b   : > { %v2106_v58 = vpop.f32.mrf.mxu0 }
 0x17c   : > { %v2107_v59 = vadd.f32 %v2106_v58, %v2105_v56  ;;  %v2174_v60 = vpop.f32.mrf.mxu1 }
 0x17d   : > { %v2175_v61 = vadd.f32 %v2174_v60, %v2173_v57  ;;  %v2108_v62 = vpop.f32.mrf.mxu0 }
 0x17e   : > { %v2176_v63 = vpop.f32.mrf.mxu1  ;;  %2295 = vmatprep.mubr.msk.f32.mxu1 %vm887_vm0, %v2107_v59 }
 0x17f   : > { %2261 = vmatprep.mubr.msk.f32.mxu0 %vm887_vm0, %v2175_v61  ;;  %v2109_v0 = vpop.f32.mrf.mxu0 }
 0x180   : > { %v2110_v1 = vadd.f32 %v2109_v0, %v2108_v62  ;;  %v2177_v2 = vpop.f32.mrf.mxu1  ;;  %v1335_v0 = vld [vmem:[%s3709_s4 + $0xb0] sm:$0xff] }
 0x181   : > { %v2178_v3 = vadd.f32 %v2177_v2, %v2176_v63  ;;  %v2111_v4 = vpop.f32.mrf.mxu0  ;;  %v1336_v63 = vld [vmem:[%s3709_s4 + $0xb8] sm:$0xff]  ;;  %v1334_v2 = vld [vmem:[%s3709_s4 + $0xa8] sm:$0xff] }
 0x182   : > { %v2179_v6 = vpop.f32.mrf.mxu1  ;;  %2296 = vmatmul.mubr.msk.f32.gmra.mxu1 %vm887_vm0, %v2110_v1 }
 0x183   : > { %2262 = vmatmul.mubr.msk.f32.vlgmr.msra.gmra.mxu0 %vm887_vm0, %v2178_v3  ;;  %v2112_v8 = vpop.f32.mrf.mxu0  ;;  %v1333_v3 = vld [vmem:[%s3709_s4 + $0xa0] sm:$0xff] }
 0x184   : > { %v2113_v10 = vadd.f32 %v2112_v8, %v2111_v4  ;;  %v2180_v11 = vpop.f32.mrf.mxu1  ;;  %1358 = vmatpush1.msra.mxu0 %v1343_v5  ;;  %v1332_v4 = vld [vmem:[%s3709_s4 + $0x98] sm:$0xff]  ;;  %v1330_v8 = vld [vmem:[%s3709_s4 + $0x88] sm:$0xff] }
 0x185   : > { %v2181_v13 = vadd.f32 %v2180_v11, %v2179_v6  ;;  %v2114_v14 = vpop.f32.mrf.mxu0  ;;  %1359 = vmatprep.subr.mxu0 %v1342_v7  ;;  %v1331_v6 = vld [vmem:[%s3709_s4 + $0x90] sm:$0xff] }
 0x186   : > { %v2182_v16 = vpop.f32.mrf.mxu1  ;;  %2298 = vmatprep.mubr.msk.f32.mxu1 %vm887_vm0, %v2113_v10  ;;  %1360 = vmatpush1.msra.mxu0 %v1341_v9  ;;  %v1329_v9 = vld [vmem:[%s3709_s4 + $0x80] sm:$0xff] }
 0x187   : > { %2264 = vmatprep.mubr.msk.f32.mxu0 %vm887_vm0, %v2181_v13  ;;  %v2115_v18 = vpop.f32.mrf.mxu0  ;;  %1361 = vmatprep.subr.mxu0 %v1340_v12  ;;  %v1328_v12 = vld [vmem:[%s3709_s4 + $0x78] sm:$0xff]  ;;  %v1327_v13 = vld [vmem:[%s3709_s4 + $0x70] sm:$0xff] }
 0x188   : > { %v2116_v20 = vadd.f32 %v2115_v18, %v2114_v14  ;;  %v2183_v21 = vpop.f32.mrf.mxu1  ;;  %1362 = vmatpush1.msra.mxu0 %v1339_v15  ;;  %v1326_v14 = vld [vmem:[%s3709_s4 + $0x68] sm:$0xff]  ;;  %v1325_v15 = vld [vmem:[%s3709_s4 + $0x60] sm:$0xff] }
 0x189   : > { %v2184_v23 = vadd.f32 %v2183_v21, %v2182_v16  ;;  %1363 = vmatprep.subr.mxu0 %v1338_v17  ;;  %v1324_v16 = vld [vmem:[%s3709_s4 + $0x58] sm:$0xff]  ;;  %v1323_v17 = vld [vmem:[%s3709_s4 + $0x50] sm:$0xff]  ;;  %v1322_v18 = vld [vmem:[%s3709_s4 + $0x48] sm:$0xff] }
 0x18a   : > { %v2185_v24 = vpop.f32.mrf.mxu1  ;;  %2299 = vmatmul.mubr.msk.f32.gmra.mxu1 %vm887_vm0, %v2116_v20  ;;  %1364 = vmatpush1.msra.mxu0 %v1337_v19  ;;  %v1321_v19 = vld [vmem:[%s3709_s4 + $0x40] sm:$0xff]  ;;  %v1320_v20 = vld [vmem:[%s3709_s4 + $0x38] sm:$0xff]  ;;  %v1319_v21 = vld [vmem:[%s3709_s4 + $0x30] sm:$0xff] }
 0x18b   : > { %2265 = vmatmul.mubr.msk.f32.gmra.mxu0 %vm887_vm0, %v2184_v23  ;;  %2301 = vmatprep.mubr.msk.f32.mxu1 %vm887_vm0, %v2119_v22  ;;  %v1318_v22 = vld [vmem:[%s3709_s4 + $0x28] sm:$0xff]  ;;  %v1317_v23 = vld [vmem:[%s3709_s4 + $0x20] sm:$0xff] }
 0x18c   : > { %v2186_v26 = vpop.f32.mrf.mxu1  ;;  %1365 = vmatprep.subr.mxu0 %v1336_v63 }
 0x18d   : > { %v2187_v37 = vadd.f32 %v2186_v26, %v2185_v24  ;;  %1366 = vmatpush1.msra.mxu0 %v1335_v0  ;;  %v1316_v24 = vld [vmem:[%s3709_s4 + $0x18] sm:$0xff]  ;;  %v1314_v26 = vld [vmem:[%s3709_s4 + $0x8] sm:$0xff] }
 0x18e   : > { %v2188_v38 = vpop.f32.mrf.mxu1  ;;  %2302 = vmatmul.mubr.msk.f32.gmra.mxu1 %vm887_vm0, %v2122_v25  ;;  %1367 = vmatprep.subr.mxu0 %v1334_v2  ;;  %v1315_v25 = vld [vmem:[%s3709_s4 + $0x10] sm:$0xff] }
 0x18f   : > { %2267 = vmatprep.mubr.msk.f32.mxu0 %vm887_vm0, %v2187_v37  ;;  %2304 = vmatprep.mubr.msk.f32.mxu1 %vm887_vm0, %v2125_v35  ;;  %v1313_v35 = vld [vmem:[%s3709_s4] sm:$0xff]  ;;  %v2555_v37 = vmov 0.0  }
 0x190   : > { %v2189_v28 = vpop.f32.mrf.mxu1  ;;  %1368 = vmatpush1.msra.mxu0 %v1333_v3 }
 0x191   : > { %v2190_v29 = vadd.f32 %v2189_v28, %v2188_v38  ;;  %1369 = vmatprep.subr.mxu0 %v1332_v4 }
 0x192   : > { %v2191_v30 = vpop.f32.mrf.mxu1  ;;  %2305 = vmatmul.mubr.msk.f32.gmra.mxu1 %vm887_vm0, %v2128_v27  ;;  %1370 = vmatpush1.msra.mxu0 %v1331_v6 }
 0x193   : > { %2268 = vmatmul.mubr.msk.f32.gmra.mxu0 %vm887_vm0, %v2190_v29  ;;  %2307 = vmatprep.mubr.msk.f32.mxu1 %vm887_vm0, %v2131_v40 }
 0x194   : > { %v2192_v32 = vpop.f32.mrf.mxu1  ;;  %1371 = vmatprep.subr.mxu0 %v1330_v8 }
 0x195   : > { %v2193_v33 = vadd.f32 %v2192_v32, %v2191_v30  ;;  %1372 = vmatpush1.msra.mxu0 %v1329_v9 }
 0x196   : > { %v2194_v34 = vpop.f32.mrf.mxu1  ;;  %2308 = vmatmul.mubr.msk.f32.gmra.mxu1 %vm887_vm0, %v2134_v31  ;;  %1373 = vmatprep.subr.mxu0 %v1328_v12  ;;  %v3288_v31 = vld [vmem:[%s3708_s3] ss:$0 sm:$0xff] }
 0x197   : > { %2270 = vmatprep.mubr.msk.f32.mxu0 %vm887_vm0, %v2193_v33  ;;  %2310 = vmatprep.mubr.msk.f32.mxu1 %vm887_vm0, %v2137_v42 }
 0x198   : > { %v2195_v39 = vpop.f32.mrf.mxu1  ;;  %1374 = vmatpush1.msra.mxu0 %v1327_v13 }
 0x199   : > { %v2196_v43 = vadd.f32 %v2195_v39, %v2194_v34  ;;  %1375 = vmatprep.subr.mxu0 %v1326_v14 }
 0x19a   : > { %v2197_v45 = vpop.f32.mrf.mxu1  ;;  %2311 = vmatmul.mubr.msk.f32.gmra.mxu1 %vm887_vm0, %v2140_v36  ;;  %1376 = vmatpush1.msra.mxu0 %v1325_v15 }
 0x19b   : > { %2271 = vmatmul.mubr.msk.f32.gmra.mxu0 %vm887_vm0, %v2196_v43  ;;  %1377 = vmatprep.subr.mxu0 %v1324_v16 }
 0x19c   : > { %v2198_v41 = vpop.f32.mrf.mxu1  ;;  %1378 = vmatpush1.msra.mxu0 %v1323_v17 }
 0x19d   : > { %v2199_v44 = vadd.f32 %v2198_v41, %v2197_v45  ;;  %1379 = vmatprep.subr.mxu0 %v1322_v18 }
 0x19e   : > { %v2200_v46 = vpop.f32.mrf.mxu1  ;;  %1380 = vmatpush1.msra.mxu0 %v1321_v19 }
 0x19f   : > { %2273 = vmatprep.mubr.msk.f32.mxu0 %vm887_vm0, %v2199_v44  ;;  %1381 = vmatprep.subr.mxu0 %v1320_v20 }
 0x1a0   : > { %v2201_v47 = vpop.f32.mrf.mxu1  ;;  %1382 = vmatpush1.msra.mxu0 %v1319_v21 }
 0x1a1   : > { %v2202_v48 = vadd.f32 %v2201_v47, %v2200_v46  ;;  %1383 = vmatprep.subr.mxu0 %v1318_v22 }
 0x1a2   : > { %v2203_v49 = vpop.f32.mrf.mxu1  ;;  %1384 = vmatpush1.msra.mxu0 %v1317_v23 }
 0x1a3   : > { %2274 = vmatmul.mubr.msk.f32.gmra.mxu0 %vm887_vm0, %v2202_v48  ;;  %1385 = vmatprep.subr.mxu0 %v1316_v24 }
 0x1a4   : > { %v2204_v51 = vpop.f32.mrf.mxu1  ;;  %1386 = vmatpush1.msra.mxu0 %v1315_v25 }
 0x1a5   : > { %v2205_v53 = vadd.f32 %v2204_v51, %v2203_v49  ;;  %1387 = vmatprep.subr.mxu0 %v1314_v26 }
 0x1a6   : > { %v2206_v52 = vpop.f32.mrf.mxu1  ;;  %1388 = vmatpush1.msra.mxu0 %v1313_v35 }
 0x1a7   : > { %2276 = vmatprep.mubr.msk.f32.mxu0 %vm887_vm0, %v2205_v53 }
 0x1a8   : > { %v2207_v54 = vpop.f32.mrf.mxu1 }
 0x1a9   : > { %v2208_v55 = vadd.f32 %v2207_v54, %v2206_v52 }
 0x1aa   : > { %v2209_v56 = vpop.f32.mrf.mxu1 }
 0x1ab   : > { %2277 = vmatmul.mubr.msk.f32.gmra.mxu0 %vm887_vm0, %v2208_v55 }
 0x1ac   : > { %v2210_v57 = vpop.f32.mrf.mxu1 }
 0x1ad   : > { %v2211_v58 = vadd.f32 %v2210_v57, %v2209_v56 }
 0x1ae   : > { %v2212_v59 = vpop.f32.mrf.mxu1 }
 0x1af   : > { %2279 = vmatprep.mubr.msk.f32.mxu0 %vm887_vm0, %v2211_v58 }
 0x1b0   : > { %v2213_v60 = vpop.f32.mrf.mxu1 }
 0x1b1   : > { %v2214_v61 = vadd.f32 %v2213_v60, %v2212_v59 }
 0x1b2   : > { %v2215_v62 = vpop.f32.mrf.mxu1 }
 0x1b3   : > { %2280 = vmatmul.mubr.msk.f32.gmra.mxu0 %vm887_vm0, %v2214_v61 }
 0x1b4   : > { %v2216_v1 = vpop.f32.mrf.mxu1 }
 0x1b5   : > { %v2217_v5 = vadd.f32 %v2216_v1, %v2215_v62 }
 0x1b6   : > { %v2218_v7 = vpop.f32.mrf.mxu1 }
 0x1b7   : > { %2282 = vmatprep.mubr.msk.f32.mxu0 %vm887_vm0, %v2217_v5 }
 0x1b8   : > { %v2219_v10 = vpop.f32.mrf.mxu1 }
 0x1b9   : > { %v2220_v11 = vadd.f32 %v2219_v10, %v2218_v7 }
 0x1bb   : > { %2283 = vmatmul.mubr.msk.f32.gmra.mxu0 %vm887_vm0, %v2220_v11 }
 0x1bc   : > { %1421 = vmatprep.mubr.f32.mxu0 %v2555_v37 }
 0x232   : > { %v2291_v38 = vpop.f32.mrf.mxu1 }
 0x234   : > { %v1195_v28 = vpop.f32.mrf.mxu1 }
 0x23a   : > { %v2294_v42 = vpop.f32.mrf.mxu1 }
 0x23c   : > { %v1205_v39 = vpop.f32.mrf.mxu1 }
 0x242   : > { %v2297_v47 = vpop.f32.mrf.mxu1 }
 0x243   : > { %v2263_v27 = vpop.f32.mrf.mxu0 }
 0x244   : > { %v1201_v29 = vadd.f32 %v2291_v38, %v2263_v27  ;;  %v1215_v53 = vpop.f32.mrf.mxu1 }
 0x245   : > { %v1002_v40 = vpop.f32.mrf.mxu0 }
 0x246   : > { %v1196_v30 = vadd.f32 %v1195_v28, %v1002_v40  ;;  %v1282_v33 = vadd.f32 %v3288_v31, %v1201_v29 }
 0x248   : > { %v1281_v32 = vadd.f32 %v3288_v31, %v1196_v30  ;;  %v1298_v45 = vmax.f32 %v1282_v33, 0.0 }
 0x24a   : > { %v1297_v34 = vmax.f32 %v1281_v32, 0.0  ;;  %v2300_v58 = vpop.f32.mrf.mxu1 }
 0x24b   : > { %v2266_v36 = vpop.f32.mrf.mxu0 }
 0x24c   : > { %1422 = vmatmul.mubr.f32.vlgmr.msra.gmra.mxu0 %v1297_v34  ;;  %v1211_v41 = vadd.f32 %v2294_v42, %v2266_v36  ;;  %v1225_v62 = vpop.f32.mrf.mxu1 }
 0x24d   : > { %v1012_v43 = vpop.f32.mrf.mxu0  ;;  %1427 = vmatprep.mubr.f32.mxu0 %v2555_v37 }
 0x24e   : > { %v1206_v44 = vadd.f32 %v1205_v39, %v1012_v43  ;;  %v1284_v48 = vadd.f32 %v3288_v31, %v1211_v41  ;;  %v2303_v4 = vpop.f32.mrf.mxu1 }
 0x250   : > { %v1283_v46 = vadd.f32 %v3288_v31, %v1206_v44  ;;  %1428 = vmatmul.mubr.f32.gmra.mxu0 %v1298_v45  ;;  %v1300_v54 = vmax.f32 %v1284_v48, 0.0  ;;  %v1235_v8 = vpop.f32.mrf.mxu1 }
 0x251   : > { %1433 = vmatprep.mubr.f32.mxu0 %v2555_v37 }
 0x252   : > { %v1299_v49 = vmax.f32 %v1283_v46, 0.0  ;;  %v2306_v14 = vpop.f32.mrf.mxu1 }
 0x253   : > { %v2269_v51 = vpop.f32.mrf.mxu0 }
 0x254   : > { %1434 = vmatmul.mubr.f32.gmra.mxu0 %v1299_v49  ;;  %v1221_v55 = vadd.f32 %v2297_v47, %v2269_v51  ;;  %v1245_v18 = vpop.f32.mrf.mxu1  ;;  %v1348_v49 = vshrl.u32 %v301_v50, 7 }
 0x255   : > { %v1022_v52 = vpop.f32.mrf.mxu0  ;;  %1439 = vmatprep.mubr.f32.mxu0 %v2555_v37 }
 0x256   : > { %v1216_v56 = vadd.f32 %v1215_v53, %v1022_v52  ;;  %v1286_v59 = vadd.f32 %v3288_v31, %v1221_v55  ;;  %v2309_v24 = vpop.f32.mrf.mxu1  ;;  %v1349_v51 = vsub.s32 0, %v1348_v49  ;;  %v1353_v53 = vsub.s32 1, %v1348_v49  ;;  %v1345_v52 = vld [vmem:[%s3710_s5] sm:$0x3] }
 0x258   : > { %v1285_v57 = vadd.f32 %v3288_v31, %v1216_v56  ;;  %1440 = vmatmul.mubr.f32.gmra.mxu0 %v1300_v54  ;;  %v1302_v0 = vmax.f32 %v1286_v59, 0.0  ;;  %v1255_v38 = vpop.f32.mrf.mxu1  ;;  %v3325_v54 = vrot.slane %v1345_v52, %v1349_v51  ;;  %v3327_v55 = vrot.slane %v1345_v52, %v1353_v53 }
 0x259   : > { %1445 = vmatprep.mubr.f32.mxu0 %v2555_v37 }
 0x25a   : > { %v1301_v60 = vmax.f32 %v1285_v57, 0.0  ;;  %v2312_v32 = vpop.f32.mrf.mxu1 }
 0x25b   : > { %v2272_v61 = vpop.f32.mrf.mxu0 }
 0x25c   : > { %1446 = vmatmul.mubr.f32.gmra.mxu0 %v1301_v60  ;;  %v1231_v1 = vadd.f32 %v2300_v58, %v2272_v61  ;;  %v1265_v36 = vpop.f32.mrf.mxu1 }
 0x25d   : > { %v1032_v63 = vpop.f32.mrf.mxu0  ;;  %1451 = vmatprep.mubr.f32.mxu0 %v2555_v37 }
 0x25e   : > { %v1226_v2 = vadd.f32 %v1225_v62, %v1032_v63  ;;  %v1288_v5 = vadd.f32 %v3288_v31, %v1231_v1 }
 0x260   : > { %v1287_v3 = vadd.f32 %v3288_v31, %v1226_v2  ;;  %1452 = vmatmul.mubr.f32.gmra.mxu0 %v1302_v0  ;;  %v1304_v10 = vmax.f32 %v1288_v5, 0.0 }
 0x261   : > { %1457 = vmatprep.mubr.f32.mxu0 %v2555_v37 }
 0x262   : > { %v1303_v6 = vmax.f32 %v1287_v3, 0.0 }
 0x263   : > { %v2275_v7 = vpop.f32.mrf.mxu0 }
 0x264   : > { %1458 = vmatmul.mubr.f32.gmra.mxu0 %v1303_v6  ;;  %v1241_v11 = vadd.f32 %v2303_v4, %v2275_v7 }
 0x265   : > { %v1042_v9 = vpop.f32.mrf.mxu0  ;;  %1463 = vmatprep.mubr.f32.mxu0 %v2555_v37 }
 0x266   : > { %v1236_v12 = vadd.f32 %v1235_v8, %v1042_v9  ;;  %v1290_v15 = vadd.f32 %v3288_v31, %v1241_v11 }
 0x268   : > { %v1289_v13 = vadd.f32 %v3288_v31, %v1236_v12  ;;  %1464 = vmatmul.mubr.f32.gmra.mxu0 %v1304_v10  ;;  %v1306_v20 = vmax.f32 %v1290_v15, 0.0 }
 0x269   : > { %1469 = vmatprep.mubr.f32.mxu0 %v2555_v37 }
 0x26a   : > { %v1305_v16 = vmax.f32 %v1289_v13, 0.0 }
 0x26b   : > { %v2278_v17 = vpop.f32.mrf.mxu0 }
 0x26c   : > { %1470 = vmatmul.mubr.f32.gmra.mxu0 %v1305_v16  ;;  %v1251_v21 = vadd.f32 %v2306_v14, %v2278_v17 }
 0x26d   : > { %v1052_v19 = vpop.f32.mrf.mxu0  ;;  %1475 = vmatprep.mubr.f32.mxu0 %v2555_v37 }
 0x26e   : > { %v1246_v22 = vadd.f32 %v1245_v18, %v1052_v19  ;;  %v1292_v25 = vadd.f32 %v3288_v31, %v1251_v21 }
 0x270   : > { %v1291_v23 = vadd.f32 %v3288_v31, %v1246_v22  ;;  %1476 = vmatmul.mubr.f32.gmra.mxu0 %v1306_v20  ;;  %v1308_v28 = vmax.f32 %v1292_v25, 0.0 }
 0x271   : > { %1481 = vmatprep.mubr.f32.mxu0 %v2555_v37 }
 0x272   : > { %v1307_v26 = vmax.f32 %v1291_v23, 0.0 }
 0x273   : > { %v2281_v35 = vpop.f32.mrf.mxu0 }
 0x274   : > { %1482 = vmatmul.mubr.f32.gmra.mxu0 %v1307_v26  ;;  %v1261_v40 = vadd.f32 %v2309_v24, %v2281_v35 }
 0x275   : > { %v1062_v27 = vpop.f32.mrf.mxu0  ;;  %1487 = vmatprep.mubr.f32.mxu0 %v2555_v37 }
 0x276   : > { %v1256_v29 = vadd.f32 %v1255_v38, %v1062_v27  ;;  %v1294_v42 = vadd.f32 %v3288_v31, %v1261_v40 }
 0x278   : > { %v1293_v30 = vadd.f32 %v3288_v31, %v1256_v29  ;;  %1488 = vmatmul.mubr.f32.gmra.mxu0 %v1308_v28  ;;  %v1310_v43 = vmax.f32 %v1294_v42, 0.0 }
 0x279   : > { %1493 = vmatprep.mubr.f32.mxu0 %v2555_v37 }
 0x27a   : > { %v1309_v33 = vmax.f32 %v1293_v30, 0.0 }
 0x27b   : > { %v2284_v34 = vpop.f32.mrf.mxu0 }
 0x27c   : > { %1494 = vmatmul.mubr.f32.gmra.mxu0 %v1309_v33  ;;  %v1271_v45 = vadd.f32 %v2312_v32, %v2284_v34 }
 0x27d   : > { %v1072_v39 = vpop.f32.mrf.mxu0  ;;  %1499 = vmatprep.mubr.f32.mxu0 %v2555_v37 }
 0x27e   : > { %v1266_v41 = vadd.f32 %v1265_v36, %v1072_v39  ;;  %v1296_v46 = vadd.f32 %v3288_v31, %v1271_v45 }
 0x280   : > { %v1295_v44 = vadd.f32 %v3288_v31, %v1266_v41  ;;  %1500 = vmatmul.mubr.f32.gmra.mxu0 %v1310_v43  ;;  %v1312_v48 = vmax.f32 %v1296_v46, 0.0 }
 0x281   : > { %1505 = vmatprep.mubr.f32.mxu0 %v2555_v37 }
 0x282   : > { %v1311_v47 = vmax.f32 %v1295_v44, 0.0 }
 0x284   : > { %1506 = vmatmul.mubr.f32.gmra.mxu0 %v1311_v47 }
 0x285   : > { %1511 = vmatprep.mubr.f32.mxu0 %v2555_v37 }
 0x288   : > { %1512 = vmatmul.mubr.f32.gmra.mxu0 %v1312_v48 }
 0x30c   : > { %v1423_v56 = vpop.f32.mrf.mxu0 }
 0x30d   : > { %v3330_v57 = vadd.f32 %v1423_v56, %v3325_v54 }
 0x30e   : > { %v1425_v31 = vpop.f32.mrf.mxu0 }
 0x30f   : > { %v3333_v37 = vadd.f32 %v1425_v31, %v3327_v55 }
 0x310   : > { %v1429_v58 = vpop.f32.mrf.mxu0 }
 0x311   : > { %v1518_v50 = vmax.f32 %v3330_v57, %v3333_v37  ;;  %v3338_v60 = vadd.f32 %v1429_v58, %v3325_v54 }
 0x312   : > { %v1431_v59 = vpop.f32.mrf.mxu0 }
 0x313   : > { %v3341_v61 = vadd.f32 %v1431_v59, %v3327_v55  ;;  %1519 = vmax.xlane.f32.xlu1 %v1518_v50 }
 0x314   : > { %v1435_v62 = vpop.f32.mrf.mxu0 }
 0x315   : > { %v1521_v63 = vmax.f32 %v3338_v60, %v3341_v61  ;;  %v3346_v1 = vadd.f32 %v1435_v62, %v3325_v54 }
 0x316   : > { %v1437_v0 = vpop.f32.mrf.mxu0 }
 0x317   : > { %v3349_v2 = vadd.f32 %v1437_v0, %v3327_v55  ;;  %1522 = vmax.xlane.f32.xlu0 %v1521_v63 }
 0x318   : > { %v1441_v3 = vpop.f32.mrf.mxu0 }
 0x319   : > { %v1524_v4 = vmax.f32 %v3346_v1, %v3349_v2  ;;  %v3354_v6 = vadd.f32 %v1441_v3, %v3325_v54 }
 0x31a   : > { %v1443_v5 = vpop.f32.mrf.mxu0 }
 0x31b   : > { %v3357_v7 = vadd.f32 %v1443_v5, %v3327_v55  ;;  %1525 = vmax.xlane.f32.xlu0 %v1524_v4 }
 0x31c   : > { %v1447_v8 = vpop.f32.mrf.mxu0 }
 0x31d   : > { %v1527_v9 = vmax.f32 %v3354_v6, %v3357_v7  ;;  %v3362_v11 = vadd.f32 %v1447_v8, %v3325_v54 }
 0x31e   : > { %v1449_v10 = vpop.f32.mrf.mxu0 }
 0x31f   : > { %v3365_v12 = vadd.f32 %v1449_v10, %v3327_v55  ;;  %1528 = vmax.xlane.f32.xlu1 %v1527_v9 }
 0x320   : > { %v1453_v13 = vpop.f32.mrf.mxu0 }
 0x321   : > { %v1530_v14 = vmax.f32 %v3362_v11, %v3365_v12  ;;  %v3370_v16 = vadd.f32 %v1453_v13, %v3325_v54 }
 0x322   : > { %v1455_v15 = vpop.f32.mrf.mxu0 }
 0x323   : > { %v3373_v17 = vadd.f32 %v1455_v15, %v3327_v55  ;;  %1531 = vmax.xlane.f32.xlu0 %v1530_v14 }
 0x324   : > { %v1459_v18 = vpop.f32.mrf.mxu0 }
 0x325   : > { %v1533_v19 = vmax.f32 %v3370_v16, %v3373_v17  ;;  %v3378_v21 = vadd.f32 %v1459_v18, %v3325_v54 }
 0x326   : > { %v1461_v20 = vpop.f32.mrf.mxu0 }
 0x327   : > { %v3381_v22 = vadd.f32 %v1461_v20, %v3327_v55  ;;  %1534 = vmax.xlane.f32.xlu1 %v1533_v19 }
 0x328   : > { %v1465_v23 = vpop.f32.mrf.mxu0 }
 0x329   : > { %v1536_v24 = vmax.f32 %v3378_v21, %v3381_v22  ;;  %v3386_v26 = vadd.f32 %v1465_v23, %v3325_v54 }
 0x32a   : > { %v1467_v25 = vpop.f32.mrf.mxu0 }
 0x32b   : > { %v3389_v35 = vadd.f32 %v1467_v25, %v3327_v55  ;;  %1537 = vmax.xlane.f32.xlu0 %v1536_v24 }
 0x32c   : > { %v1471_v38 = vpop.f32.mrf.mxu0 }
 0x32d   : > { %v1539_v27 = vmax.f32 %v3386_v26, %v3389_v35  ;;  %v3394_v40 = vadd.f32 %v1471_v38, %v3325_v54 }
 0x32e   : > { %v1473_v28 = vpop.f32.mrf.mxu0 }
 0x32f   : > { %v3397_v29 = vadd.f32 %v1473_v28, %v3327_v55  ;;  %1540 = vmax.xlane.f32.xlu1 %v1539_v27 }
 0x330   : > { %v1477_v30 = vpop.f32.mrf.mxu0 }
 0x331   : > { %v1542_v32 = vmax.f32 %v3394_v40, %v3397_v29  ;;  %v3402_v33 = vadd.f32 %v1477_v30, %v3325_v54 }
 0x332   : > { %v1479_v42 = vpop.f32.mrf.mxu0 }
 0x333   : > { %v3405_v34 = vadd.f32 %v1479_v42, %v3327_v55  ;;  %1543 = vmax.xlane.f32.xlu0 %v1542_v32 }
 0x334   : > { %v1483_v36 = vpop.f32.mrf.mxu0 }
 0x335   : > { %v1545_v39 = vmax.f32 %v3402_v33, %v3405_v34  ;;  %v3410_v45 = vadd.f32 %v1483_v36, %v3325_v54 }
 0x336   : > { %v1485_v43 = vpop.f32.mrf.mxu0 }
 0x337   : > { %v3413_v41 = vadd.f32 %v1485_v43, %v3327_v55  ;;  %1546 = vmax.xlane.f32.xlu1 %v1545_v39 }
 0x338   : > { %v1489_v44 = vpop.f32.mrf.mxu0 }
 0x339   : > { %v1548_v46 = vmax.f32 %v3410_v45, %v3413_v41  ;;  %v3418_v48 = vadd.f32 %v1489_v44, %v3325_v54 }
 0x33a   : > { %v1491_v47 = vpop.f32.mrf.mxu0 }
 0x33b   : > { %v3421_v49 = vadd.f32 %v1491_v47, %v3327_v55  ;;  %1549 = vmax.xlane.f32.xlu0 %v1548_v46 }
 0x33c   : > { %v1495_v51 = vpop.f32.mrf.mxu0 }
 0x33d   : > { %v1551_v53 = vmax.f32 %v3418_v48, %v3421_v49  ;;  %v3426_v56 = vadd.f32 %v1495_v51, %v3325_v54 }
 0x33e   : > { %v1497_v52 = vpop.f32.mrf.mxu0 }
 0x33f   : > { %v3429_v31 = vadd.f32 %v1497_v52, %v3327_v55  ;;  %1552 = vmax.xlane.f32.xlu1 %v1551_v53 }
 0x340   : > { %v1501_v58 = vpop.f32.mrf.mxu0 }
 0x341   : > { %v1554_v50 = vmax.f32 %v3426_v56, %v3429_v31  ;;  %v3434_v62 = vadd.f32 %v1501_v58, %v3325_v54 }
 0x342   : > { %v1503_v59 = vpop.f32.mrf.mxu0 }
 0x343   : > { %v3437_v63 = vadd.f32 %v1503_v59, %v3327_v55  ;;  %1555 = vmax.xlane.f32.xlu0 %v1554_v50 }
 0x344   : > { %v1507_v0 = vpop.f32.mrf.mxu0 }
 0x345   : > { %v1557_v3 = vmax.f32 %v3434_v62, %v3437_v63  ;;  %v3442_v5 = vadd.f32 %v1507_v0, %v3325_v54 }
 0x346   : > { %v1509_v4 = vpop.f32.mrf.mxu0 }
 0x347   : > { %v3445_v8 = vadd.f32 %v1509_v4, %v3327_v55  ;;  %1558 = vmax.xlane.f32.xlu1 %v1557_v3 }
 0x348   : > { %v1513_v9 = vpop.f32.mrf.mxu0 }
 0x349   : > { %v1560_v10 = vmax.f32 %v3442_v5, %v3445_v8  ;;  %v3450_v14 = vadd.f32 %v1513_v9, %v3325_v54 }
 0x34a   : > { %v1515_v13 = vpop.f32.mrf.mxu0 }
 0x34b   : > { %v3453_v15 = vadd.f32 %v1515_v13, %v3327_v55  ;;  %1561 = vmax.xlane.f32.xlu0 %v1560_v10 }
 0x34d   : > { %v1563_v18 = vmax.f32 %v3450_v14, %v3453_v15 }
 0x34f   : > { %1564 = vmax.xlane.f32.xlu1 %v1563_v18 }
 0x39c   : > { %v1520_v19 = vpop.xlane.xlu1 %1519 }
 0x39d   : > { %v3458_v20 = vsub.f32 %v3330_v57, %v1520_v19  ;;  %v3461_v23 = vsub.f32 %v3333_v37, %v1520_v19 }
 0x39f   : > { %v1598_v24 = vmul.f32 1.442695, %v3458_v20  ;;  %v1600_v54 = vmul.f32 1.442695, %v3461_v23 }
 0x3a0   : > { %v1523_v25 = vpop.xlane.xlu0 %1522 }
 0x3a1   : > { %2394 = vpow2.f32 %v1598_v24  ;;  %v3466_v55 = vsub.f32 %v3338_v60, %v1523_v25  ;;  %v3469_v38 = vsub.f32 %v3341_v61, %v1523_v25 }
 0x3a2   : > { %2396 = vpow2.f32 %v1600_v54 }
 0x3a3   : > { %v1602_v27 = vmul.f32 1.442695, %v3466_v55  ;;  %v1604_v57 = vmul.f32 1.442695, %v3469_v38 }
 0x3a4   : > { %v1526_v28 = vpop.xlane.xlu0 %1525 }
 0x3a5   : > { %2398 = vpow2.f32 %v1602_v27  ;;  %v3474_v37 = vsub.f32 %v3346_v1, %v1526_v28  ;;  %v3477_v30 = vsub.f32 %v3349_v2, %v1526_v28 }
 0x3a6   : > { %2400 = vpow2.f32 %v1604_v57 }
 0x3a7   : > { %v1606_v60 = vmul.f32 1.442695, %v3474_v37  ;;  %v1608_v32 = vmul.f32 1.442695, %v3477_v30 }
 0x3a8   : > { %v1529_v61 = vpop.xlane.xlu1 %1528 }
 0x3a9   : > { %2402 = vpow2.f32 %v1606_v60  ;;  %v3482_v42 = vsub.f32 %v3354_v6, %v1529_v61  ;;  %v3485_v36 = vsub.f32 %v3357_v7, %v1529_v61 }
 0x3aa   : > { %2404 = vpow2.f32 %v1608_v32 }
 0x3ab   : > { %v1610_v1 = vmul.f32 1.442695, %v3482_v42  ;;  %v1612_v39 = vmul.f32 1.442695, %v3485_v36 }
 0x3ac   : > { %v1532_v2 = vpop.xlane.xlu0 %1531 }
 0x3ad   : > { %2406 = vpow2.f32 %v1610_v1  ;;  %v3490_v43 = vsub.f32 %v3362_v11, %v1532_v2  ;;  %v3493_v44 = vsub.f32 %v3365_v12, %v1532_v2 }
 0x3ae   : > { %v2395_v46 = vpop.eup %2394  ;;  %2408 = vpow2.f32 %v1612_v39 }
 0x3af   : > { %v2397_v6 = vpop.eup %2396  ;;  %v1614_v47 = vmul.f32 1.442695, %v3490_v43  ;;  %v1616_v7 = vmul.f32 1.442695, %v3493_v44 }
 0x3b0   : > { %v1535_v51 = vpop.xlane.xlu1 %1534  ;;  %v1662_v53 = vadd.f32 %v2397_v6, %v2395_v46 }
 0x3b1   : > { %2410 = vpow2.f32 %v1614_v47  ;;  %v3498_v52 = vsub.f32 %v3370_v16, %v1535_v51  ;;  %v3501_v58 = vsub.f32 %v3373_v17, %v1535_v51 }
 0x3b2   : > { %v2399_v11 = vpop.eup %2398  ;;  %2412 = vpow2.f32 %v1616_v7  ;;  %1663 = vadd.xlane.f32.xlu0 %v1662_v53 }
 0x3b3   : > { %v2401_v12 = vpop.eup %2400  ;;  %v1618_v50 = vmul.f32 1.442695, %v3498_v52  ;;  %v1620_v59 = vmul.f32 1.442695, %v3501_v58 }
 0x3b4   : > { %v1538_v0 = vpop.xlane.xlu0 %1537  ;;  %v1665_v3 = vadd.f32 %v2401_v12, %v2399_v11 }
 0x3b5   : > { %2414 = vpow2.f32 %v1618_v50  ;;  %v3506_v4 = vsub.f32 %v3378_v21, %v1538_v0  ;;  %v3509_v16 = vsub.f32 %v3381_v22, %v1538_v0 }
 0x3b6   : > { %v2403_v9 = vpop.eup %2402  ;;  %2416 = vpow2.f32 %v1620_v59  ;;  %1666 = vadd.xlane.f32.xlu1 %v1665_v3 }
 0x3b7   : > { %v2405_v17 = vpop.eup %2404  ;;  %v1622_v10 = vmul.f32 1.442695, %v3506_v4  ;;  %v1624_v13 = vmul.f32 1.442695, %v3509_v16 }
 0x3b8   : > { %v1541_v18 = vpop.xlane.xlu1 %1540  ;;  %v1668_v19 = vadd.f32 %v2405_v17, %v2403_v9 }
 0x3b9   : > { %2418 = vpow2.f32 %v1622_v10  ;;  %v3514_v24 = vsub.f32 %v3386_v26, %v1541_v18  ;;  %v3517_v21 = vsub.f32 %v3389_v35, %v1541_v18 }
 0x3ba   : > { %v2407_v54 = vpop.eup %2406  ;;  %2420 = vpow2.f32 %v1624_v13  ;;  %1669 = vadd.xlane.f32.xlu0 %v1668_v19 }
 0x3bb   : > { %v2409_v22 = vpop.eup %2408  ;;  %v1626_v25 = vmul.f32 1.442695, %v3514_v24  ;;  %v1628_v27 = vmul.f32 1.442695, %v3517_v21 }
 0x3bc   : > { %v1544_v57 = vpop.xlane.xlu0 %1543  ;;  %v1671_v28 = vadd.f32 %v2409_v22, %v2407_v54 }
 0x3bd   : > { %2422 = vpow2.f32 %v1626_v25  ;;  %v3522_v60 = vsub.f32 %v3394_v40, %v1544_v57  ;;  %v3525_v26 = vsub.f32 %v3397_v29, %v1544_v57 }
 0x3be   : > { %v2411_v32 = vpop.eup %2410  ;;  %2424 = vpow2.f32 %v1628_v27  ;;  %1672 = vadd.xlane.f32.xlu1 %v1671_v28 }
 0x3bf   : > { %v2413_v35 = vpop.eup %2412  ;;  %v1630_v61 = vmul.f32 1.442695, %v3522_v60  ;;  %v1632_v1 = vmul.f32 1.442695, %v3525_v26 }
 0x3c0   : > { %v1547_v39 = vpop.xlane.xlu1 %1546  ;;  %v1674_v2 = vadd.f32 %v2413_v35, %v2411_v32 }
 0x3c1   : > { %2426 = vpow2.f32 %v1630_v61  ;;  %v3530_v46 = vsub.f32 %v3402_v33, %v1547_v39  ;;  %v3533_v40 = vsub.f32 %v3405_v34, %v1547_v39 }
 0x3c2   : > { %v2415_v6 = vpop.eup %2414  ;;  %2428 = vpow2.f32 %v1632_v1  ;;  %1675 = vadd.xlane.f32.xlu0 %v1674_v2 }
 0x3c3   : > { %v2417_v29 = vpop.eup %2416  ;;  %v1634_v47 = vmul.f32 1.442695, %v3530_v46  ;;  %v1636_v7 = vmul.f32 1.442695, %v3533_v40 }
 0x3c4   : > { %v1550_v51 = vpop.xlane.xlu0 %1549  ;;  %v1677_v53 = vadd.f32 %v2417_v29, %v2415_v6 }
 0x3c5   : > { %2430 = vpow2.f32 %v1634_v47  ;;  %v3538_v11 = vsub.f32 %v3410_v45, %v1550_v51  ;;  %v3541_v33 = vsub.f32 %v3413_v41, %v1550_v51 }
 0x3c6   : > { %v2419_v12 = vpop.eup %2418  ;;  %2432 = vpow2.f32 %v1636_v7  ;;  %1678 = vadd.xlane.f32.xlu1 %v1677_v53 }
 0x3c7   : > { %v2421_v34 = vpop.eup %2420  ;;  %v1638_v50 = vmul.f32 1.442695, %v3538_v11  ;;  %v1640_v59 = vmul.f32 1.442695, %v3541_v33 }
 0x3c8   : > { %v1553_v0 = vpop.xlane.xlu1 %1552  ;;  %v1680_v3 = vadd.f32 %v2421_v34, %v2419_v12 }
 0x3c9   : > { %2434 = vpow2.f32 %v1638_v50  ;;  %v3546_v9 = vsub.f32 %v3418_v48, %v1553_v0  ;;  %v3549_v45 = vsub.f32 %v3421_v49, %v1553_v0 }
 0x3ca   : > { %v2423_v17 = vpop.eup %2422  ;;  %2436 = vpow2.f32 %v1640_v59  ;;  %1681 = vadd.xlane.f32.xlu0 %v1680_v3 }
 0x3cb   : > { %v2425_v41 = vpop.eup %2424  ;;  %v1642_v10 = vmul.f32 1.442695, %v3546_v9  ;;  %v1644_v13 = vmul.f32 1.442695, %v3549_v45 }
 0x3cc   : > { %v1556_v18 = vpop.xlane.xlu0 %1555  ;;  %v1683_v19 = vadd.f32 %v2425_v41, %v2423_v17 }
 0x3cd   : > { %2438 = vpow2.f32 %v1642_v10  ;;  %v3554_v54 = vsub.f32 %v3426_v56, %v1556_v18  ;;  %v3557_v48 = vsub.f32 %v3429_v31, %v1556_v18 }
 0x3ce   : > { %v2427_v22 = vpop.eup %2426  ;;  %2440 = vpow2.f32 %v1644_v13  ;;  %1684 = vadd.xlane.f32.xlu1 %v1683_v19 }
 0x3cf   : > { %v2429_v49 = vpop.eup %2428  ;;  %v1646_v25 = vmul.f32 1.442695, %v3554_v54  ;;  %v1648_v27 = vmul.f32 1.442695, %v3557_v48 }
 0x3d0   : > { %v1559_v57 = vpop.xlane.xlu1 %1558  ;;  %v1686_v28 = vadd.f32 %v2429_v49, %v2427_v22 }
 0x3d1   : > { %2442 = vpow2.f32 %v1646_v25  ;;  %v3562_v32 = vsub.f32 %v3434_v62, %v1559_v57  ;;  %v3565_v56 = vsub.f32 %v3437_v63, %v1559_v57 }
 0x3d2   : > { %v2431_v35 = vpop.eup %2430  ;;  %2444 = vpow2.f32 %v1648_v27  ;;  %1687 = vadd.xlane.f32.xlu0 %v1686_v28 }
 0x3d3   : > { %v2433_v31 = vpop.eup %2432  ;;  %v1650_v61 = vmul.f32 1.442695, %v3562_v32  ;;  %v1652_v1 = vmul.f32 1.442695, %v3565_v56 }
 0x3d4   : > { %v1562_v39 = vpop.xlane.xlu0 %1561  ;;  %v1689_v2 = vadd.f32 %v2433_v31, %v2431_v35 }
 0x3d5   : > { %2446 = vpow2.f32 %v1650_v61  ;;  %v3570_v6 = vsub.f32 %v3442_v5, %v1562_v39  ;;  %v3573_v62 = vsub.f32 %v3445_v8, %v1562_v39 }
 0x3d6   : > { %v2435_v29 = vpop.eup %2434  ;;  %2448 = vpow2.f32 %v1652_v1  ;;  %1690 = vadd.xlane.f32.xlu1 %v1689_v2 }
 0x3d7   : > { %v2437_v63 = vpop.eup %2436  ;;  %v1654_v47 = vmul.f32 1.442695, %v3570_v6  ;;  %v1656_v7 = vmul.f32 1.442695, %v3573_v62 }
 0x3d8   : > { %v1565_v51 = vpop.xlane.xlu1 %1564  ;;  %v1692_v53 = vadd.f32 %v2437_v63, %v2435_v29 }
 0x3d9   : > { %2450 = vpow2.f32 %v1654_v47  ;;  %v3578_v12 = vsub.f32 %v3450_v14, %v1565_v51  ;;  %v3581_v5 = vsub.f32 %v3453_v15, %v1565_v51 }
 0x3da   : > { %v2439_v34 = vpop.eup %2438  ;;  %2452 = vpow2.f32 %v1656_v7  ;;  %1693 = vadd.xlane.f32.xlu0 %v1692_v53 }
 0x3db   : > { %v2441_v8 = vpop.eup %2440  ;;  %v1658_v50 = vmul.f32 1.442695, %v3578_v12  ;;  %v1660_v59 = vmul.f32 1.442695, %v3581_v5 }
 0x3dc   : > { %v1695_v0 = vadd.f32 %v2441_v8, %v2439_v34 }
 0x3dd   : > { %2454 = vpow2.f32 %v1658_v50 }
 0x3de   : > { %v2443_v3 = vpop.eup %2442  ;;  %2456 = vpow2.f32 %v1660_v59  ;;  %1696 = vadd.xlane.f32.xlu1 %v1695_v0 }
 0x3df   : > { %v2445_v17 = vpop.eup %2444 }
 0x3e0   : > { %v1698_v41 = vadd.f32 %v2445_v17, %v2443_v3 }
 0x3e2   : > { %v2447_v14 = vpop.eup %2446  ;;  %1699 = vadd.xlane.f32.xlu0 %v1698_v41 }
 0x3e3   : > { %v2449_v10 = vpop.eup %2448 }
 0x3e4   : > { %v1701_v15 = vadd.f32 %v2449_v10, %v2447_v14 }
 0x3e6   : > { %v2451_v13 = vpop.eup %2450  ;;  %1702 = vadd.xlane.f32.xlu1 %v1701_v15 }
 0x3e7   : > { %v2453_v18 = vpop.eup %2452 }
 0x3e8   : > { %v1704_v19 = vadd.f32 %v2453_v18, %v2451_v13 }
 0x3ea   : > { %v2455_v22 = vpop.eup %2454  ;;  %1705 = vadd.xlane.f32.xlu0 %v1704_v19 }
 0x3eb   : > { %v2457_v49 = vpop.eup %2456 }
 0x3ec   : > { %v1707_v25 = vadd.f32 %v2457_v49, %v2455_v22 }
 0x3ee   : > { %1708 = vadd.xlane.f32.xlu1 %v1707_v25 }
 0x43b   : > { %v1664_v27 = vpop.xlane.xlu0 %1663 }
 0x43c   : > { %2458 = vlog2.f32 %v1664_v27 }
 0x43f   : > { %v1667_v57 = vpop.xlane.xlu1 %1666 }
 0x440   : > { %2460 = vlog2.f32 %v1667_v57 }
 0x443   : > { %v1670_v28 = vpop.xlane.xlu0 %1669 }
 0x444   : > { %2462 = vlog2.f32 %v1670_v28 }
 0x447   : > { %v1673_v35 = vpop.xlane.xlu1 %1672 }
 0x448   : > { %2464 = vlog2.f32 %v1673_v35 }
 0x449   : > { %v2459_v31 = vpop.eup %2458 }
 0x44a   : > { %v1711_v61 = vmul.f32 0.6931472, %v2459_v31 }
 0x44b   : > { %v1676_v1 = vpop.xlane.xlu0 %1675 }
 0x44c   : > { %v1742_v39 = vsub.f32 %v3458_v20, %v1711_v61  ;;  %v1743_v2 = vsub.f32 %v3461_v23, %v1711_v61  ;;  %2466 = vlog2.f32 %v1676_v1 }
 0x44d   : > { %v2461_v29 = vpop.eup %2460 }
 0x44e   : > { %1774 = vst [vmem:[%s3590_s29] sm:$0xff] %v1742_v39  ;;  %1775 = vst [vmem:[%s3590_s29 + $0x8] sm:$0xff] %v1743_v2  ;;  %v1713_v63 = vmul.f32 0.6931472, %v2461_v29 }
 0x44f   : > { %v1679_v47 = vpop.xlane.xlu1 %1678 }
 0x450   : > { %v1744_v7 = vsub.f32 %v3466_v55, %v1713_v63  ;;  %v1745_v20 = vsub.f32 %v3469_v38, %v1713_v63  ;;  %2468 = vlog2.f32 %v1679_v47 }
 0x451   : > { %v2463_v23 = vpop.eup %2462 }
 0x452   : > { %1776 = vst [vmem:[%s3590_s29 + $0x10] sm:$0xff] %v1744_v7  ;;  %1777 = vst [vmem:[%s3590_s29 + $0x18] sm:$0xff] %v1745_v20  ;;  %v1715_v51 = vmul.f32 0.6931472, %v2463_v23 }
 0x453   : > { %v1682_v53 = vpop.xlane.xlu0 %1681 }
 0x454   : > { %v1746_v34 = vsub.f32 %v3474_v37, %v1715_v51  ;;  %v1747_v8 = vsub.f32 %v3477_v30, %v1715_v51  ;;  %2470 = vlog2.f32 %v1682_v53 }
 0x455   : > { %v2465_v50 = vpop.eup %2464 }
 0x456   : > { %1778 = vst [vmem:[%s3590_s29 + $0x20] sm:$0xff] %v1746_v34  ;;  %1779 = vst [vmem:[%s3590_s29 + $0x28] sm:$0xff] %v1747_v8  ;;  %v1717_v55 = vmul.f32 0.6931472, %v2465_v50 }
 0x457   : > { %v1685_v38 = vpop.xlane.xlu1 %1684 }
 0x458   : > { %v1748_v59 = vsub.f32 %v3482_v42, %v1717_v55  ;;  %v1749_v0 = vsub.f32 %v3485_v36, %v1717_v55  ;;  %2472 = vlog2.f32 %v1685_v38 }
 0x459   : > { %v2467_v3 = vpop.eup %2466 }
 0x45a   : > { %1780 = vst [vmem:[%s3590_s29 + $0x30] sm:$0xff] %v1748_v59  ;;  %1781 = vst [vmem:[%s3590_s29 + $0x38] sm:$0xff] %v1749_v0  ;;  %v1719_v37 = vmul.f32 0.6931472, %v2467_v3 }
 0x45b   : > { %v1688_v30 = vpop.xlane.xlu0 %1687 }
 0x45c   : > { %v1750_v17 = vsub.f32 %v3490_v43, %v1719_v37  ;;  %v1751_v41 = vsub.f32 %v3493_v44, %v1719_v37  ;;  %2474 = vlog2.f32 %v1688_v30 }
 0x45d   : > { %v2469_v14 = vpop.eup %2468 }
 0x45e   : > { %1782 = vst [vmem:[%s3590_s29 + $0x40] sm:$0xff] %v1750_v17  ;;  %1783 = vst [vmem:[%s3590_s29 + $0x48] sm:$0xff] %v1751_v41  ;;  %v1721_v42 = vmul.f32 0.6931472, %v2469_v14 }
 0x45f   : > { %v1691_v36 = vpop.xlane.xlu1 %1690 }
 0x460   : > { %v1752_v10 = vsub.f32 %v3498_v52, %v1721_v42  ;;  %v1753_v15 = vsub.f32 %v3501_v58, %v1721_v42  ;;  %2476 = vlog2.f32 %v1691_v36 }
 0x461   : > { %v2471_v13 = vpop.eup %2470 }
 0x462   : > { %1784 = vst [vmem:[%s3590_s29 + $0x50] sm:$0xff] %v1752_v10  ;;  %1785 = vst [vmem:[%s3590_s29 + $0x58] sm:$0xff] %v1753_v15  ;;  %v1723_v43 = vmul.f32 0.6931472, %v2471_v13 }
 0x463   : > { %v1694_v44 = vpop.xlane.xlu0 %1693 }
 0x464   : > { %v1754_v18 = vsub.f32 %v3506_v4, %v1723_v43  ;;  %v1755_v19 = vsub.f32 %v3509_v16, %v1723_v43  ;;  %2478 = vlog2.f32 %v1694_v44 }
 0x465   : > { %v2473_v22 = vpop.eup %2472 }
 0x466   : > { %1786 = vst [vmem:[%s3590_s29 + $0x60] sm:$0xff] %v1754_v18  ;;  %1787 = vst [vmem:[%s3590_s29 + $0x68] sm:$0xff] %v1755_v19  ;;  %v1725_v52 = vmul.f32 0.6931472, %v2473_v22 }
 0x467   : > { %v1697_v58 = vpop.xlane.xlu1 %1696 }
 0x468   : > { %v1756_v49 = vsub.f32 %v3514_v24, %v1725_v52  ;;  %v1757_v25 = vsub.f32 %v3517_v21, %v1725_v52  ;;  %2480 = vlog2.f32 %v1697_v58 }
 0x469   : > { %v2475_v27 = vpop.eup %2474 }
 0x46a   : > { %1788 = vst [vmem:[%s3590_s29 + $0x70] sm:$0xff] %v1756_v49  ;;  %1789 = vst [vmem:[%s3590_s29 + $0x78] sm:$0xff] %v1757_v25  ;;  %v1727_v4 = vmul.f32 0.6931472, %v2475_v27 }
 0x46b   : > { %v1700_v16 = vpop.xlane.xlu0 %1699 }
 0x46c   : > { %v1758_v57 = vsub.f32 %v3522_v60, %v1727_v4  ;;  %v1759_v28 = vsub.f32 %v3525_v26, %v1727_v4  ;;  %2482 = vlog2.f32 %v1700_v16 }
 0x46d   : > { %v2477_v35 = vpop.eup %2476 }
 0x46e   : > { %1790 = vst [vmem:[%s3590_s29 + $0x80] sm:$0xff] %v1758_v57  ;;  %1791 = vst [vmem:[%s3590_s29 + $0x88] sm:$0xff] %v1759_v28  ;;  %v1729_v24 = vmul.f32 0.6931472, %v2477_v35 }
 0x46f   : > { %v1703_v21 = vpop.xlane.xlu1 %1702 }
 0x470   : > { %v1760_v31 = vsub.f32 %v3530_v46, %v1729_v24  ;;  %v1761_v61 = vsub.f32 %v3533_v40, %v1729_v24  ;;  %2484 = vlog2.f32 %v1703_v21 }
 0x471   : > { %v2479_v1 = vpop.eup %2478 }
 0x472   : > { %1792 = vst [vmem:[%s3590_s29 + $0x90] sm:$0xff] %v1760_v31  ;;  %1793 = vst [vmem:[%s3590_s29 + $0x98] sm:$0xff] %v1761_v61  ;;  %v1731_v60 = vmul.f32 0.6931472, %v2479_v1 }
 0x473   : > { %v1706_v26 = vpop.xlane.xlu0 %1705 }
 0x474   : > { %v1762_v39 = vsub.f32 %v3538_v11, %v1731_v60  ;;  %v1763_v2 = vsub.f32 %v3541_v33, %v1731_v60  ;;  %2486 = vlog2.f32 %v1706_v26 }
 0x475   : > { %v2481_v29 = vpop.eup %2480 }
 0x476   : > { %1794 = vst [vmem:[%s3590_s29 + $0xa0] sm:$0xff] %v1762_v39  ;;  %1795 = vst [vmem:[%s3590_s29 + $0xa8] sm:$0xff] %v1763_v2  ;;  %v1733_v46 = vmul.f32 0.6931472, %v2481_v29 }
 0x477   : > { %v1709_v40 = vpop.xlane.xlu1 %1708 }
 0x478   : > { %v1764_v63 = vsub.f32 %v3546_v9, %v1733_v46  ;;  %v1765_v47 = vsub.f32 %v3549_v45, %v1733_v46  ;;  %2488 = vlog2.f32 %v1709_v40 }
 0x479   : > { %v2483_v7 = vpop.eup %2482 }
 0x47a   : > { %1796 = vst [vmem:[%s3590_s29 + $0xb0] sm:$0xff] %v1764_v63  ;;  %1797 = vst [vmem:[%s3590_s29 + $0xb8] sm:$0xff] %v1765_v47  ;;  %v1735_v11 = vmul.f32 0.6931472, %v2483_v7 }
 0x47c   : > { %v1766_v33 = vsub.f32 %v3554_v54, %v1735_v11  ;;  %v1767_v20 = vsub.f32 %v3557_v48, %v1735_v11 }
 0x47d   : > { %v2485_v23 = vpop.eup %2484 }
 0x47e   : > { %1798 = vst [vmem:[%s3590_s29 + $0xc0] sm:$0xff] %v1766_v33  ;;  %1799 = vst [vmem:[%s3590_s29 + $0xc8] sm:$0xff] %v1767_v20  ;;  %v1737_v9 = vmul.f32 0.6931472, %v2485_v23 }
 0x480   : > { %v1768_v45 = vsub.f32 %v3562_v32, %v1737_v9  ;;  %v1769_v51 = vsub.f32 %v3565_v56, %v1737_v9 }
 0x481   : > { %v2487_v53 = vpop.eup %2486 }
 0x482   : > { %1800 = vst [vmem:[%s3590_s29 + $0xd0] sm:$0xff] %v1768_v45  ;;  %1801 = vst [vmem:[%s3590_s29 + $0xd8] sm:$0xff] %v1769_v51  ;;  %v1739_v34 = vmul.f32 0.6931472, %v2487_v53 }
 0x484   : > { %v1770_v54 = vsub.f32 %v3570_v6, %v1739_v34  ;;  %v1771_v48 = vsub.f32 %v3573_v62, %v1739_v34 }
 0x485   : > { %v2489_v8 = vpop.eup %2488 }
 0x486   : > { %1802 = vst [vmem:[%s3590_s29 + $0xe0] sm:$0xff] %v1770_v54  ;;  %1803 = vst [vmem:[%s3590_s29 + $0xe8] sm:$0xff] %v1771_v48  ;;  %v1741_v32 = vmul.f32 0.6931472, %v2489_v8 }
 0x488   : > { %v1772_v56 = vsub.f32 %v3578_v12, %v1741_v32  ;;  %v1773_v6 = vsub.f32 %v3581_v5, %v1741_v32 }
 0x48a   : > { %1804 = vst [vmem:[%s3590_s29 + $0xf0] sm:$0xff] %v1772_v56  ;;  %1805 = vst [vmem:[%s3590_s29 + $0xf8] sm:$0xff] %v1773_v6 }
 0x48b   : > { %2503 = shalt.err (!%p2500_p3)
}
 0x48c   : > { %s2504_s19 = scalar_lea.hbm %s3655_s14, 4096  ;;  %s2508_s26 = scalar_lea.hbm %s3711_s6, 8192 }
 0x48d   : > { %p2505_p4 = scmp.ne.s32.totalorder %s3655_s14, %s2504_s19  ;;  %p2509_p9 = scmp.lt.s32.totalorder %s3655_s14, %s3711_s6 }
 0x48e   : > { %p2510_p10 = scmp.lt.s32.totalorder %s2508_s26, %s2504_s19 }
 0x48f   : > { %p2506_p7 = pnand %p2505_p4, %p2632_p5 }
 0x490   : > { %p2511_p11 = por %p2510_p10, %p2509_p9 }
 0x491   : > { %p2507_p8 = pneg %p2506_p7 }
 0x493   : > { %p2512_p12 = pnand %p2511_p11, %p2507_p8 }
 0x495   : > { %2515 = shalt.err (!%p2512_p12)
}
 0x496   : > { %s2557_s10 = smov 256   ;;  %s2558_s13 = smov 16  }
 0x497   : > { %2345 = dma.vmem_to_hbm [thread:$0]  (%p2632_p5), %s3657_s12, 4096, %s3655_s14, %s3665_s25, %s2557_s10, %s2557_s10, %s2558_s13  }
 0x498 PF: > { %p2351_p13 = scmp.ge.s32.totalorder %s2550_s24, 2  ;;  %s1836_s9 = sand.u32 1, %s2538_s21  }
 0x499   : > { %s1837_s15 = scalar_lea.sflag [#allocation3], %s1836_s9 }
 0x49a   : > { %p2348_p0 = pnand %p2351_p13, %p2636_p6 }
 0x49c   : > { %p2349_p1 = pneg %p2348_p0 }
 0x49e   : > { %2533 = dma.done.wait (%p2349_p1), %s1837_s15, 4096  }
 0x49f   : > { %2535 = vsyncadd (%p2349_p1), %s1837_s15, 4294963200  ;;  %p16_p2 = scmp.ge.s32.totalorder %s2619_s27, 4   ;;  %s3714_s21 = smov %s2542_s22 }
 0x4a0   : > { %s3715_s22 = smov %s2546_s23  ;;  %s3716_s23 = smov %s2630_s30 }
 0x4a1   : > { %s3717_s24 = smov %s2619_s27  ;;  %18 = sbr.rel (!%p16_p2) target bundleno = 3 (0x3), region = 80 }
 0x4a6   :  { %1842 = vsyncpa [#allocation3], 1 }
 0x4a7   :  { %1844 = vsyncpa [#allocation3 + $0x1], 1 }

</bundles_post_ra>
